<compile_context>
chip_gen: v7x
topology: tpu7x:2x2x1
jax: 0.10.0
libtpu: 0.0.40
codegen_flags: <defaults>
</compile_context>

<pallas_src>
from functools import partial

import jax
import jax.numpy as jnp
from jax.experimental import pallas as pl
from jax.experimental.pallas import tpu as pltpu

# ----------------------------- static config --------------------------------
IN_FEATURE     = 16
TRUNK_LAYERS   = 6
TRUNK_HIDDEN   = 64
RGB_LAYERS     = 2
RGB_HIDDEN     = 32
RGB_CHANNELS   = 3
ALPHA_LAYERS   = 2
ALPHA_HIDDEN   = 32
ALPHA_CHANNELS = 1
SKIPS          = (4,)     # applies inside the trunk MLP
COND_DIM       = 8        # width of alpha_condition / rgb_condition

BATCH       = 2
NUM_SAMPLES = 64

BRANCH_FUSED = RGB_HIDDEN + ALPHA_HIDDEN          # fused branch width (64)
FUSED_OUT    = RGB_CHANNELS + ALPHA_CHANNELS      # fused head width (4)

# The fused-branch packing below assumes these (true for this config).
assert BRANCH_FUSED == TRUNK_HIDDEN
assert RGB_LAYERS == ALPHA_LAYERS
assert all(s >= RGB_LAYERS for s in SKIPS)        # no skips inside the branches


# ---------------------------- parameter set-up ------------------------------
def _linear_params(key, in_dim, out_dim):
    kw, kb = jax.random.split(key)
    w = jax.random.normal(kw, (in_dim, out_dim), jnp.float32) / jnp.sqrt(
        jnp.float32(in_dim))
    b = 0.01 * jax.random.normal(kb, (1, out_dim), jnp.float32)
    return w, b


def _mlp_params(key, layer_num, in_feature, hidden_dim, out_feature, skips):
    keys = jax.random.split(key, layer_num + 1)
    ws, bs = [], []
    for i in range(layer_num):
        if i == 0:
            in_dim = in_feature
        elif i in skips:
            in_dim = hidden_dim + in_feature
        else:
            in_dim = hidden_dim
        w, b = _linear_params(keys[i], in_dim, hidden_dim)
        ws.append(w)
        bs.append(b)
    out_w = out_b = None
    if out_feature > 0:
        out_w, out_b = _linear_params(keys[-1], hidden_dim, out_feature)
    return ws, bs, out_w, out_b


def build_params(key):
    k_trunk, k_bott, k_alpha, k_rgb = jax.random.split(key, 4)
    t_ws, t_bs, _, _ = _mlp_params(
        k_trunk, TRUNK_LAYERS, IN_FEATURE, TRUNK_HIDDEN, 0, SKIPS)
    bott_w, bott_b = _linear_params(k_bott, TRUNK_HIDDEN, TRUNK_HIDDEN)
    a_ws, a_bs, a_ow, a_ob = _mlp_params(
        k_alpha, ALPHA_LAYERS, TRUNK_HIDDEN + COND_DIM, ALPHA_HIDDEN,
        ALPHA_CHANNELS, SKIPS)
    r_ws, r_bs, r_ow, r_ob = _mlp_params(
        k_rgb, RGB_LAYERS, TRUNK_HIDDEN + COND_DIM, RGB_HIDDEN,
        RGB_CHANNELS, SKIPS)
    flat = (list(t_ws) + list(t_bs) + [bott_w, bott_b]
            + list(a_ws) + list(a_bs) + [a_ow, a_ob]
            + list(r_ws) + list(r_bs) + [r_ow, r_ob])
    return flat


def _split_params(vals):
    it = iter(vals)
    t_ws = [next(it) for _ in range(TRUNK_LAYERS)]
    t_bs = [next(it) for _ in range(TRUNK_LAYERS)]
    bott_w, bott_b = next(it), next(it)
    a_ws = [next(it) for _ in range(ALPHA_LAYERS)]
    a_bs = [next(it) for _ in range(ALPHA_LAYERS)]
    a_ow, a_ob = next(it), next(it)
    r_ws = [next(it) for _ in range(RGB_LAYERS)]
    r_bs = [next(it) for _ in range(RGB_LAYERS)]
    r_ow, r_ob = next(it), next(it)
    return (t_ws, t_bs, bott_w, bott_b, a_ws, a_bs, a_ow, a_ob,
            r_ws, r_bs, r_ow, r_ob)


# ------------------------- packed-slab layout (static) -----------------------
def _weight_layout():
    """Ordered list of (name, rows) blocks in the packed bf16 weight slab.
    Every block has exactly TRUNK_HIDDEN (=BRANCH_FUSED) columns."""
    layout = []
    for i in range(TRUNK_LAYERS):
        if i == 0:
            layout.append((f"t{i}", IN_FEATURE))
        elif i in SKIPS:
            layout.append((f"t{i}_in", IN_FEATURE))      # rows multiplying `inputs`
            layout.append((f"t{i}_h", TRUNK_HIDDEN))     # rows multiplying h
        else:
            layout.append((f"t{i}", TRUNK_HIDDEN))
    layout.append(("bott", TRUNK_HIDDEN))
    layout.append(("br0", TRUNK_HIDDEN))                 # bottleneck part of branch L0
    for i in range(1, RGB_LAYERS):
        layout.append((f"br{i}", BRANCH_FUSED))          # block-diag fused
    layout.append(("out", BRANCH_FUSED))                 # fused head, padded to 64 cols
    offs, o = {}, 0
    for name, rows in layout:
        offs[name] = (o, o + rows)
        o += rows
    return layout, offs, o


def _bias_layout():
    rows = {}
    r = 0
    for i in range(TRUNK_LAYERS):
        rows[f"t{i}"] = r
        r += 1
    rows["bott"] = r
    r += 1
    for i in range(1, RGB_LAYERS):
        rows[f"br{i}"] = r
        r += 1
    rows["out"] = r
    r += 1
    padded = ((r + 7) // 8) * 8
    return rows, r, padded


W_LAYOUT, W_OFFS, W_TOTAL_ROWS = _weight_layout()
B_ROW, B_ROWS, B_ROWS_PADDED = _bias_layout()

# All static slice starts are sublane-aligned even for bf16 row-packing.
assert all(W_OFFS[name][0] % 16 == 0 for name, _ in W_LAYOUT)


def pack_params(params):
    """Pack the torch-layout parameter list into:
       - one bf16 weight slab [W_TOTAL_ROWS, TRUNK_HIDDEN]
       - one f32 bias slab   [B_ROWS_PADDED, TRUNK_HIDDEN]
       - the branch layer-0 condition sub-weights/biases (used in the wrapper).
    Fused column layout for the branch section: rgb = cols 0:RGB_HIDDEN,
    alpha = cols RGB_HIDDEN:BRANCH_FUSED; fused head: rgb cols 0:3, alpha col 3."""
    (t_ws, t_bs, bott_w, bott_b, a_ws, a_bs, a_ow, a_ob,
     r_ws, r_bs, r_ow, r_ob) = _split_params(params)
    H = TRUNK_HIDDEN

    blocks = {}
    for i in range(TRUNK_LAYERS):
        if i in SKIPS and i != 0:
            # concat order in the reference is [inputs, h] -> rows 0:IN_FEATURE = inputs
            blocks[f"t{i}_in"] = t_ws[i][:IN_FEATURE, :]
            blocks[f"t{i}_h"] = t_ws[i][IN_FEATURE:, :]
        else:
            blocks[f"t{i}"] = t_ws[i]
    blocks["bott"] = bott_w

    # branch layer 0: split the condition rows off (concat order [bottleneck, cond])
    r_w0, a_w0 = r_ws[0], a_ws[0]
    blocks["br0"] = jnp.concatenate([r_w0[:H, :], a_w0[:H, :]], axis=1)
    r_wc, a_wc = r_w0[H:, :], a_w0[H:, :]

    # branch layers >= 1: block-diagonal fusion
    for i in range(1, RGB_LAYERS):
        blocks[f"br{i}"] = jnp.block(
            [[r_ws[i], jnp.zeros((RGB_HIDDEN, ALPHA_HIDDEN), jnp.float32)],
             [jnp.zeros((ALPHA_HIDDEN, RGB_HIDDEN), jnp.float32), a_ws[i]]])

    # fused output head, zero-padded to BRANCH_FUSED columns (only 0:4 used)
    out_w = jnp.zeros((BRANCH_FUSED, BRANCH_FUSED), jnp.float32)
    out_w = out_w.at[:RGB_HIDDEN, :RGB_CHANNELS].set(r_ow)
    out_w = out_w.at[RGB_HIDDEN:, RGB_CHANNELS:FUSED_OUT].set(a_ow)
    blocks["out"] = out_w

    w_slab = jnp.concatenate(
        [blocks[name] for name, _ in W_LAYOUT], axis=0).astype(jnp.bfloat16)

    bias_rows = [t_bs[i] for i in range(TRUNK_LAYERS)] + [bott_b]
    bias_rows += [jnp.concatenate([r_bs[i], a_bs[i]], axis=1)
                  for i in range(1, RGB_LAYERS)]
    out_b = jnp.zeros((1, BRANCH_FUSED), jnp.float32)
    out_b = out_b.at[:, :RGB_CHANNELS].set(r_ob)
    out_b = out_b.at[:, RGB_CHANNELS:FUSED_OUT].set(a_ob)
    bias_rows.append(out_b)
    b_slab = jnp.concatenate(bias_rows, axis=0)
    pad = B_ROWS_PADDED - b_slab.shape[0]
    if pad:
        b_slab = jnp.concatenate(
            [b_slab, jnp.zeros((pad, b_slab.shape[1]), jnp.float32)], axis=0)

    # branch layer-0 condition projections + biases are applied in the wrapper
    return w_slab, b_slab, r_wc, a_wc, r_bs[0], a_bs[0]


# --------------------------------- kernel ------------------------------------
def nerf_mlp_kernel(x_ref, cond_ref, w_ref, b_ref, out_ref):
    """One row-tile of the full NeRF MLP (trunk + bottleneck + fused branches)."""

    def mm(a, name):
        lo, hi = W_OFFS[name]
        return jnp.dot(a.astype(jnp.bfloat16), w_ref[lo:hi, :],
                       preferred_element_type=jnp.float32)

    def bias(name):
        r = B_ROW[name]
        return b_ref[r:r + 1, :]

    x = x_ref[...]          # [T, IN_FEATURE] f32
    cond = cond_ref[...]    # [T, BRANCH_FUSED] f32 (layer-0 cond contribution + bias)

    # ---- trunk MLP (ReLU hidden layers, skip = split matmul, no concat) ----
    h = x
    for i in range(TRUNK_LAYERS):
        if i == 0:
            z = mm(x, f"t{i}")
        elif i in SKIPS:
            z = mm(x, f"t{i}_in") + mm(h, f"t{i}_h")
        else:
            z = mm(h, f"t{i}")
        h = jnp.maximum(z + bias(f"t{i}"), 0.0)

    # ---- bottleneck (linear, no activation) ----
    bott = mm(h, "bott") + bias("bott")

    # ---- fused rgb|alpha branch MLP ----
    br = jnp.maximum(mm(bott, "br0") + cond, 0.0)
    for i in range(1, RGB_LAYERS):
        br = jnp.maximum(mm(br, f"br{i}") + bias(f"br{i}"), 0.0)

    # ---- fused output head (ReLU output activation) ----
    out_full = jnp.maximum(mm(br, "out") + bias("out"), 0.0)   # [T, 64]
    out_ref[...] = out_full[:, :FUSED_OUT]                      # rgb 0:3, alpha 3


# --------------------------------- wrapper -----------------------------------
@partial(jax.jit, static_argnames=("tile_rows",))
def nerf_mlp_forward(x, alpha_condition, rgb_condition, params, tile_rows=None):
    """x: [batch, num_samples, feature]; conditions: [batch, cond_dim]."""
    batch, num_samples, feat = x.shape
    n = batch * num_samples
    if tile_rows is None:
        # Collapse the grid at small sizes; cap tiles at 512 rows for larger n
        # (comfortably within v7x's 64 MiB VMEM; shardable across 2 TCs).
        tile_rows = n if n <= 512 else 512
    assert n % tile_rows == 0 and tile_rows % 8 == 0

    x2 = x.reshape(n, feat)
    w_slab, b_slab, r_wc, a_wc, r_b0, a_b0 = pack_params(params)

    # Hoisted condition projection: only `batch` unique rows -> project once,
    # add the fused branch-0 bias, then broadcast to every sample row.
    cond_b = jnp.concatenate(
        [jnp.dot(rgb_condition, r_wc) + r_b0,
         jnp.dot(alpha_condition, a_wc) + a_b0], axis=-1)      # [batch, 64]
    cond_rows = jnp.broadcast_to(
        cond_b[:, None, :], (batch, num_samples, BRANCH_FUSED)
    ).reshape(n, BRANCH_FUSED)

    # advisory cost estimate
    macs = 0
    for i in range(TRUNK_LAYERS):
        if i == 0:
            macs += IN_FEATURE * TRUNK_HIDDEN
        elif i in SKIPS:
            macs += (IN_FEATURE + TRUNK_HIDDEN) * TRUNK_HIDDEN
        else:
            macs += TRUNK_HIDDEN * TRUNK_HIDDEN
    macs += TRUNK_HIDDEN * TRUNK_HIDDEN                       # bottleneck
    macs += TRUNK_HIDDEN * BRANCH_FUSED                       # fused branch 0
    macs += (RGB_LAYERS - 1) * BRANCH_FUSED * BRANCH_FUSED    # fused branch 1+
    macs += BRANCH_FUSED * BRANCH_FUSED                       # fused (padded) head
    cost = pl.CostEstimate(
        flops=2 * n * macs,
        transcendentals=0,
        bytes_accessed=4 * (x2.size + cond_rows.size + b_slab.size + n * FUSED_OUT)
        + 2 * w_slab.size)

    raw = pl.pallas_call(
        nerf_mlp_kernel,
        grid=(n // tile_rows,),
        in_specs=[
            pl.BlockSpec((tile_rows, feat), lambda i: (i, 0)),
            pl.BlockSpec((tile_rows, BRANCH_FUSED), lambda i: (i, 0)),
            pl.BlockSpec(w_slab.shape, lambda i: (0, 0)),   # packed weight slab
            pl.BlockSpec(b_slab.shape, lambda i: (0, 0)),   # packed bias slab
        ],
        out_specs=pl.BlockSpec((tile_rows, FUSED_OUT), lambda i: (i, 0)),
        out_shape=jax.ShapeDtypeStruct((n, FUSED_OUT), jnp.float32),
        compiler_params=pltpu.CompilerParams(
            dimension_semantics=("parallel",)),
        cost_estimate=cost,
    )(x2, cond_rows, w_slab, b_slab)

    rgb = raw[:, :RGB_CHANNELS].reshape(-1, num_samples, RGB_CHANNELS)
    alpha = raw[:, RGB_CHANNELS:FUSED_OUT].reshape(-1, num_samples, ALPHA_CHANNELS)
    return {"rgb": rgb, "alpha": alpha}


# ----------------------- pure-JAX (f32, concat-based) reference ---------------
def _mlp_apply(h, ws, bs, out_w, out_b, skips):
    inputs = h
    for i, (w, b) in enumerate(zip(ws, bs)):
        if i in skips:
            h = jnp.concatenate([inputs, h], axis=-1)
        h = jnp.dot(h, w, preferred_element_type=jnp.float32) + b
        h = jnp.maximum(h, 0.0)
    if out_w is not None:
        h = jnp.dot(h, out_w, preferred_element_type=jnp.float32) + out_b
        h = jnp.maximum(h, 0.0)
    return h


def nerf_mlp_reference(x, alpha_condition, rgb_condition, params):
    (t_ws, t_bs, bott_w, bott_b, a_ws, a_bs, a_ow, a_ob,
     r_ws, r_bs, r_ow, r_ob) = _split_params(params)
    batch, num_samples, feat = x.shape
    n = batch * num_samples
    x2 = x.reshape(n, feat)
    ac = jnp.tile(alpha_condition[:, None, :], (1, num_samples, 1)).reshape(n, -1)
    rc = jnp.tile(rgb_condition[:, None, :], (1, num_samples, 1)).reshape(n, -1)

    h = _mlp_apply(x2, t_ws, t_bs, None, None, SKIPS)
    bottleneck = jnp.dot(h, bott_w, preferred_element_type=jnp.float32) + bott_b
    alpha_in = jnp.concatenate([bottleneck, ac], axis=-1)
    rgb_in = jnp.concatenate([bottleneck, rc], axis=-1)
    alpha = _mlp_apply(alpha_in, a_ws, a_bs, a_ow, a_ob, SKIPS)
    rgb = _mlp_apply(rgb_in, r_ws, r_bs, r_ow, r_ob, SKIPS)
    return {
        "rgb": rgb.reshape(-1, num_samples, RGB_CHANNELS),
        "alpha": alpha.reshape(-1, num_samples, ALPHA_CHANNELS),
    }


# ----------------------------------- main ------------------------------------
if __name__ == "__main__":
    key = jax.random.PRNGKey(0)
    k_x, k_ac, k_rc, k_params = jax.random.split(key, 4)

    x = jax.random.normal(k_x, (BATCH, NUM_SAMPLES, IN_FEATURE), jnp.float32)
    alpha_condition = jax.random.normal(k_ac, (BATCH, COND_DIM), jnp.float32)
    rgb_condition = jax.random.normal(k_rc, (BATCH, COND_DIM), jnp.float32)
    params = build_params(k_params)

    out = nerf_mlp_forward(x, alpha_condition, rgb_condition, params)
    out = jax.tree_util.tree_map(jax.block_until_ready, out)

    ref = nerf_mlp_reference(x, alpha_condition, rgb_condition, params)
    assert out["rgb"].shape == (BATCH, NUM_SAMPLES, RGB_CHANNELS)
    assert out["alpha"].shape == (BATCH, NUM_SAMPLES, ALPHA_CHANNELS)
    # Kernel uses bf16 MXU operands with f32 accumulation (and a restructured,
    # concat-free formulation); compare against the f32 concat-based reference
    # with correspondingly looser tolerances.
    assert jnp.allclose(out["rgb"], ref["rgb"], rtol=5e-2, atol=5e-2)
    assert jnp.allclose(out["alpha"], ref["alpha"], rtol=5e-2, atol=5e-2)

    print("KERNEL_OK")
</pallas_src>

<mosaic_0001>
module attributes {stable_mosaic.version = 11 : i64} {
  func.func @nerf_mlp_kernel(%arg0: i32, %arg1: memref<128x16xf32, #tpu.memory_space<vmem>>, %arg2: memref<128x64xf32, #tpu.memory_space<vmem>>, %arg3: memref<608x64xbf16, #tpu.memory_space<vmem>>, %arg4: memref<16x64xf32, #tpu.memory_space<vmem>>, %arg5: memref<128x4xf32, #tpu.memory_space<vmem>>) attributes {dimension_semantics = [#tpu.dimension_semantics<parallel>], iteration_bounds = array<i64: 1>, scalar_prefetch = 0 : i64, scratch_operands = 0 : i64, tpu.core_type = #tpu.core_type<tc>, window_params = [{transform_indices = @transform_0, window_bounds = array<i64: 128, 16>}, {transform_indices = @transform_1, window_bounds = array<i64: 128, 64>}, {pipeline_mode = #tpu.pipeline_mode<synchronous>, transform_indices = @transform_2, window_bounds = array<i64: 608, 64>}, {pipeline_mode = #tpu.pipeline_mode<synchronous>, transform_indices = @transform_3, window_bounds = array<i64: 16, 64>}, {transform_indices = @transform_4, window_bounds = array<i64: 128, 4>}]} {
    %c0 = arith.constant 0 : index
    %c0_0 = arith.constant 0 : index
    %0 = vector.load %arg1[%c0, %c0_0] : memref<128x16xf32, #tpu.memory_space<vmem>>, vector<128x16xf32>
    %c0_1 = arith.constant 0 : index
    %c0_2 = arith.constant 0 : index
    %1 = vector.load %arg2[%c0_1, %c0_2] : memref<128x64xf32, #tpu.memory_space<vmem>>, vector<128x64xf32>
    %2 = arith.truncf %0 : vector<128x16xf32> to vector<128x16xbf16>
    %c0_3 = arith.constant 0 : index
    %c0_4 = arith.constant 0 : index
    %3 = vector.load %arg3[%c0_3, %c0_4] : memref<608x64xbf16, #tpu.memory_space<vmem>>, vector<16x64xbf16>
    %cst = arith.constant dense<0.000000e+00> : vector<128x64xf32>
    %4 = tpu.matmul %2, %3, %cst {dimension_numbers = #tpu.dot_dimension_numbers<[1], [0], [0], [1], [0, 0, 1, 1], [], []>} : vector<128x16xbf16>, vector<16x64xbf16>, vector<128x64xf32> -> vector<128x64xf32>
    %c0_5 = arith.constant 0 : index
    %c0_6 = arith.constant 0 : index
    %5 = vector.load %arg4[%c0_5, %c0_6] : memref<16x64xf32, #tpu.memory_space<vmem>>, vector<1x64xf32>
    %6 = vector.broadcast %5 : vector<1x64xf32> to vector<128x64xf32>
    %7 = arith.addf %4, %6 : vector<128x64xf32>
    %cst_7 = arith.constant 0.000000e+00 : f32
    %8 = vector.broadcast %cst_7 : f32 to vector<128x64xf32>
    %9 = arith.maximumf %7, %8 : vector<128x64xf32>
    %10 = arith.truncf %9 : vector<128x64xf32> to vector<128x64xbf16>
    %c16 = arith.constant 16 : index
    %c0_8 = arith.constant 0 : index
    %11 = vector.load %arg3[%c16, %c0_8] : memref<608x64xbf16, #tpu.memory_space<vmem>>, vector<64x64xbf16>
    %cst_9 = arith.constant dense<0.000000e+00> : vector<128x64xf32>
    %12 = tpu.matmul %10, %11, %cst_9 {dimension_numbers = #tpu.dot_dimension_numbers<[1], [0], [0], [1], [0, 0, 1, 1], [], []>} : vector<128x64xbf16>, vector<64x64xbf16>, vector<128x64xf32> -> vector<128x64xf32>
    %c1 = arith.constant 1 : index
    %c0_10 = arith.constant 0 : index
    %13 = vector.load %arg4[%c1, %c0_10] : memref<16x64xf32, #tpu.memory_space<vmem>>, vector<1x64xf32>
    %14 = vector.broadcast %13 : vector<1x64xf32> to vector<128x64xf32>
    %15 = arith.addf %12, %14 : vector<128x64xf32>
    %cst_11 = arith.constant 0.000000e+00 : f32
    %16 = vector.broadcast %cst_11 : f32 to vector<128x64xf32>
    %17 = arith.maximumf %15, %16 : vector<128x64xf32>
    %18 = arith.truncf %17 : vector<128x64xf32> to vector<128x64xbf16>
    %c80 = arith.constant 80 : index
    %c0_12 = arith.constant 0 : index
    %19 = vector.load %arg3[%c80, %c0_12] : memref<608x64xbf16, #tpu.memory_space<vmem>>, vector<64x64xbf16>
    %cst_13 = arith.constant dense<0.000000e+00> : vector<128x64xf32>
    %20 = tpu.matmul %18, %19, %cst_13 {dimension_numbers = #tpu.dot_dimension_numbers<[1], [0], [0], [1], [0, 0, 1, 1], [], []>} : vector<128x64xbf16>, vector<64x64xbf16>, vector<128x64xf32> -> vector<128x64xf32>
    %c2 = arith.constant 2 : index
    %c0_14 = arith.constant 0 : index
    %21 = vector.load %arg4[%c2, %c0_14] : memref<16x64xf32, #tpu.memory_space<vmem>>, vector<1x64xf32>
    %22 = vector.broadcast %21 : vector<1x64xf32> to vector<128x64xf32>
    %23 = arith.addf %20, %22 : vector<128x64xf32>
    %cst_15 = arith.constant 0.000000e+00 : f32
    %24 = vector.broadcast %cst_15 : f32 to vector<128x64xf32>
    %25 = arith.maximumf %23, %24 : vector<128x64xf32>
    %26 = arith.truncf %25 : vector<128x64xf32> to vector<128x64xbf16>
    %c144 = arith.constant 144 : index
    %c0_16 = arith.constant 0 : index
    %27 = vector.load %arg3[%c144, %c0_16] : memref<608x64xbf16, #tpu.memory_space<vmem>>, vector<64x64xbf16>
    %cst_17 = arith.constant dense<0.000000e+00> : vector<128x64xf32>
    %28 = tpu.matmul %26, %27, %cst_17 {dimension_numbers = #tpu.dot_dimension_numbers<[1], [0], [0], [1], [0, 0, 1, 1], [], []>} : vector<128x64xbf16>, vector<64x64xbf16>, vector<128x64xf32> -> vector<128x64xf32>
    %c3 = arith.constant 3 : index
    %c0_18 = arith.constant 0 : index
    %29 = vector.load %arg4[%c3, %c0_18] : memref<16x64xf32, #tpu.memory_space<vmem>>, vector<1x64xf32>
    %30 = vector.broadcast %29 : vector<1x64xf32> to vector<128x64xf32>
    %31 = arith.addf %28, %30 : vector<128x64xf32>
    %cst_19 = arith.constant 0.000000e+00 : f32
    %32 = vector.broadcast %cst_19 : f32 to vector<128x64xf32>
    %33 = arith.maximumf %31, %32 : vector<128x64xf32>
    %34 = arith.truncf %0 : vector<128x16xf32> to vector<128x16xbf16>
    %c208 = arith.constant 208 : index
    %c0_20 = arith.constant 0 : index
    %35 = vector.load %arg3[%c208, %c0_20] : memref<608x64xbf16, #tpu.memory_space<vmem>>, vector<16x64xbf16>
    %cst_21 = arith.constant dense<0.000000e+00> : vector<128x64xf32>
    %36 = tpu.matmul %34, %35, %cst_21 {dimension_numbers = #tpu.dot_dimension_numbers<[1], [0], [0], [1], [0, 0, 1, 1], [], []>} : vector<128x16xbf16>, vector<16x64xbf16>, vector<128x64xf32> -> vector<128x64xf32>
    %37 = arith.truncf %33 : vector<128x64xf32> to vector<128x64xbf16>
    %c224 = arith.constant 224 : index
    %c0_22 = arith.constant 0 : index
    %38 = vector.load %arg3[%c224, %c0_22] : memref<608x64xbf16, #tpu.memory_space<vmem>>, vector<64x64xbf16>
    %cst_23 = arith.constant dense<0.000000e+00> : vector<128x64xf32>
    %39 = tpu.matmul %37, %38, %cst_23 {dimension_numbers = #tpu.dot_dimension_numbers<[1], [0], [0], [1], [0, 0, 1, 1], [], []>} : vector<128x64xbf16>, vector<64x64xbf16>, vector<128x64xf32> -> vector<128x64xf32>
    %40 = arith.addf %36, %39 : vector<128x64xf32>
    %c4 = arith.constant 4 : index
    %c0_24 = arith.constant 0 : index
    %41 = vector.load %arg4[%c4, %c0_24] : memref<16x64xf32, #tpu.memory_space<vmem>>, vector<1x64xf32>
    %42 = vector.broadcast %41 : vector<1x64xf32> to vector<128x64xf32>
    %43 = arith.addf %40, %42 : vector<128x64xf32>
    %cst_25 = arith.constant 0.000000e+00 : f32
    %44 = vector.broadcast %cst_25 : f32 to vector<128x64xf32>
    %45 = arith.maximumf %43, %44 : vector<128x64xf32>
    %46 = arith.truncf %45 : vector<128x64xf32> to vector<128x64xbf16>
    %c288 = arith.constant 288 : index
    %c0_26 = arith.constant 0 : index
    %47 = vector.load %arg3[%c288, %c0_26] : memref<608x64xbf16, #tpu.memory_space<vmem>>, vector<64x64xbf16>
    %cst_27 = arith.constant dense<0.000000e+00> : vector<128x64xf32>
    %48 = tpu.matmul %46, %47, %cst_27 {dimension_numbers = #tpu.dot_dimension_numbers<[1], [0], [0], [1], [0, 0, 1, 1], [], []>} : vector<128x64xbf16>, vector<64x64xbf16>, vector<128x64xf32> -> vector<128x64xf32>
    %c5 = arith.constant 5 : index
    %c0_28 = arith.constant 0 : index
    %49 = vector.load %arg4[%c5, %c0_28] : memref<16x64xf32, #tpu.memory_space<vmem>>, vector<1x64xf32>
    %50 = vector.broadcast %49 : vector<1x64xf32> to vector<128x64xf32>
    %51 = arith.addf %48, %50 : vector<128x64xf32>
    %cst_29 = arith.constant 0.000000e+00 : f32
    %52 = vector.broadcast %cst_29 : f32 to vector<128x64xf32>
    %53 = arith.maximumf %51, %52 : vector<128x64xf32>
    %54 = arith.truncf %53 : vector<128x64xf32> to vector<128x64xbf16>
    %c352 = arith.constant 352 : index
    %c0_30 = arith.constant 0 : index
    %55 = vector.load %arg3[%c352, %c0_30] : memref<608x64xbf16, #tpu.memory_space<vmem>>, vector<64x64xbf16>
    %cst_31 = arith.constant dense<0.000000e+00> : vector<128x64xf32>
    %56 = tpu.matmul %54, %55, %cst_31 {dimension_numbers = #tpu.dot_dimension_numbers<[1], [0], [0], [1], [0, 0, 1, 1], [], []>} : vector<128x64xbf16>, vector<64x64xbf16>, vector<128x64xf32> -> vector<128x64xf32>
    %c6 = arith.constant 6 : index
    %c0_32 = arith.constant 0 : index
    %57 = vector.load %arg4[%c6, %c0_32] : memref<16x64xf32, #tpu.memory_space<vmem>>, vector<1x64xf32>
    %58 = vector.broadcast %57 : vector<1x64xf32> to vector<128x64xf32>
    %59 = arith.addf %56, %58 : vector<128x64xf32>
    %60 = arith.truncf %59 : vector<128x64xf32> to vector<128x64xbf16>
    %c416 = arith.constant 416 : index
    %c0_33 = arith.constant 0 : index
    %61 = vector.load %arg3[%c416, %c0_33] : memref<608x64xbf16, #tpu.memory_space<vmem>>, vector<64x64xbf16>
    %cst_34 = arith.constant dense<0.000000e+00> : vector<128x64xf32>
    %62 = tpu.matmul %60, %61, %cst_34 {dimension_numbers = #tpu.dot_dimension_numbers<[1], [0], [0], [1], [0, 0, 1, 1], [], []>} : vector<128x64xbf16>, vector<64x64xbf16>, vector<128x64xf32> -> vector<128x64xf32>
    %63 = arith.addf %62, %1 : vector<128x64xf32>
    %cst_35 = arith.constant 0.000000e+00 : f32
    %64 = vector.broadcast %cst_35 : f32 to vector<128x64xf32>
    %65 = arith.maximumf %63, %64 : vector<128x64xf32>
    %66 = arith.truncf %65 : vector<128x64xf32> to vector<128x64xbf16>
    %c480 = arith.constant 480 : index
    %c0_36 = arith.constant 0 : index
    %67 = vector.load %arg3[%c480, %c0_36] : memref<608x64xbf16, #tpu.memory_space<vmem>>, vector<64x64xbf16>
    %cst_37 = arith.constant dense<0.000000e+00> : vector<128x64xf32>
    %68 = tpu.matmul %66, %67, %cst_37 {dimension_numbers = #tpu.dot_dimension_numbers<[1], [0], [0], [1], [0, 0, 1, 1], [], []>} : vector<128x64xbf16>, vector<64x64xbf16>, vector<128x64xf32> -> vector<128x64xf32>
    %c7 = arith.constant 7 : index
    %c0_38 = arith.constant 0 : index
    %69 = vector.load %arg4[%c7, %c0_38] : memref<16x64xf32, #tpu.memory_space<vmem>>, vector<1x64xf32>
    %70 = vector.broadcast %69 : vector<1x64xf32> to vector<128x64xf32>
    %71 = arith.addf %68, %70 : vector<128x64xf32>
    %cst_39 = arith.constant 0.000000e+00 : f32
    %72 = vector.broadcast %cst_39 : f32 to vector<128x64xf32>
    %73 = arith.maximumf %71, %72 : vector<128x64xf32>
    %74 = arith.truncf %73 : vector<128x64xf32> to vector<128x64xbf16>
    %c544 = arith.constant 544 : index
    %c0_40 = arith.constant 0 : index
    %75 = vector.load %arg3[%c544, %c0_40] : memref<608x64xbf16, #tpu.memory_space<vmem>>, vector<64x64xbf16>
    %cst_41 = arith.constant dense<0.000000e+00> : vector<128x64xf32>
    %76 = tpu.matmul %74, %75, %cst_41 {dimension_numbers = #tpu.dot_dimension_numbers<[1], [0], [0], [1], [0, 0, 1, 1], [], []>} : vector<128x64xbf16>, vector<64x64xbf16>, vector<128x64xf32> -> vector<128x64xf32>
    %c8 = arith.constant 8 : index
    %c0_42 = arith.constant 0 : index
    %77 = vector.load %arg4[%c8, %c0_42] : memref<16x64xf32, #tpu.memory_space<vmem>>, vector<1x64xf32>
    %78 = vector.broadcast %77 : vector<1x64xf32> to vector<128x64xf32>
    %79 = arith.addf %76, %78 : vector<128x64xf32>
    %cst_43 = arith.constant 0.000000e+00 : f32
    %80 = vector.broadcast %cst_43 : f32 to vector<128x64xf32>
    %81 = arith.maximumf %79, %80 : vector<128x64xf32>
    %82 = vector.extract_strided_slice %81 {offsets = [0, 0], sizes = [128, 4], strides = [1, 1]} : vector<128x64xf32> to vector<128x4xf32>
    %c0_44 = arith.constant 0 : index
    %c0_45 = arith.constant 0 : index
    %83 = vector.load %arg5[%c0_44, %c0_45] : memref<128x4xf32, #tpu.memory_space<vmem>>, vector<128x4xf32>
    tpu.vector_store %arg5[%c0_44, %c0_45], %82 {strides = array<i32>} : memref<128x4xf32, #tpu.memory_space<vmem>>, vector<128x4xf32>,
    return
  }
  func.func @transform_0(%arg0: i32) -> (i32, i32) {
    %c0_i32 = arith.constant 0 : i32
    %c0_i32_0 = arith.constant 0 : i32
    return %arg0, %c0_i32 : i32, i32
  }
  func.func @transform_1(%arg0: i32) -> (i32, i32) {
    %c0_i32 = arith.constant 0 : i32
    %c0_i32_0 = arith.constant 0 : i32
    return %arg0, %c0_i32 : i32, i32
  }
  func.func @transform_2(%arg0: i32) -> (i32, i32) {
    %c0_i32 = arith.constant 0 : i32
    %c0_i32_0 = arith.constant 0 : i32
    %c0_i32_1 = arith.constant 0 : i32
    return %c0_i32, %c0_i32_0 : i32, i32
  }
  func.func @transform_3(%arg0: i32) -> (i32, i32) {
    %c0_i32 = arith.constant 0 : i32
    %c0_i32_0 = arith.constant 0 : i32
    %c0_i32_1 = arith.constant 0 : i32
    return %c0_i32, %c0_i32_0 : i32, i32
  }
  func.func @transform_4(%arg0: i32) -> (i32, i32) {
    %c0_i32 = arith.constant 0 : i32
    %c0_i32_0 = arith.constant 0 : i32
    return %arg0, %c0_i32 : i32, i32
  }
}

</mosaic_0001>

<bundles_post_ra>
// kernel: nerf_mlp_forward.1
= control target key start
LH: loop header
LB: loop body
LE: loop exit
PB: predicated region body
PF: predicated region fallthrough
CT: control target
= control target key end

     0   :  { %vm71_vm0 = vcmask 130048   ;;  %vm254_vm1 = vcmask 523264   ;;  %vm1948_vm2 = vcmask 31744   ;;  %s3002_s2 = inlined_call_operand.vmem [shape: bf16[608,64], index: 2, kind: input, shape index: {}]   ;;  %s3003_s0 = inlined_call_operand.vmem [shape: f32[128,16], index: 0, kind: input, shape index: {}]   ;;  %s3004_s3 = inlined_call_operand.vmem [shape: f32[16,64], index: 3, kind: input, shape index: {}]   ;;  %s3005_s1 = inlined_call_operand.vmem [shape: f32[128,64], index: 1, kind: input, shape index: {}]   ;;  %s3006_s4 = inlined_call_operand.vmem [shape: f32[128,4], index: 4, kind: output, shape index: {}]  }
   0x1   :  { %v2500_v0 = vld [vmem:[%s3002_s2] sm:$0xff]   ;;  %v19_v2 = vld [vmem:[%s3003_s0 + $0x8] sm:$0xff]  ;;  %v20_v3 = vld [vmem:[%s3003_s0 + $0x10] sm:$0xff] }
   0x2   :  { %v18_v1 = vld [vmem:[%s3003_s0] sm:$0xff]  ;;  %2230 = vmatprep.subr.bf16.mxu0 %v2500_v0  ;;  %v21_v5 = vld [vmem:[%s3003_s0 + $0x18] sm:$0xff]  ;;  %v23_v7 = vld [vmem:[%s3003_s0 + $0x28] sm:$0xff]  ;;  %2482 = vmatprep.subr.bf16.mxu1 %v2500_v0 }
   0x3   :  { %v2575_v4 = vpack.c.bf16 %v19_v2, %v18_v1  ;;  %v22_v6 = vld [vmem:[%s3003_s0 + $0x20] sm:$0xff]  ;;  %2231 = vmatpush3.bf16.msra.mxu0 %v2500_v0  ;;  %v2586_v8 = vpack.c.bf16 %v21_v5, %v20_v3  ;;  %2483 = vmatpush3.bf16.msra.mxu1 %v2500_v0  ;;  %v27_v11 = vld [vmem:[%s3003_s0 + $0x48] sm:$0xff]  ;;  %v28_v12 = vld [vmem:[%s3003_s0 + $0x50] sm:$0xff] }
   0x4   :  { %v2588_v9 = vpack.c.bf16 %v23_v7, %v22_v6  ;;  %v26_v10 = vld [vmem:[%s3003_s0 + $0x40] sm:$0xff]  ;;  %v29_v13 = vld [vmem:[%s3003_s0 + $0x58] sm:$0xff]  ;;  %v24_v14 = vld [vmem:[%s3003_s0 + $0x30] sm:$0xff] }
   0x5   :  { %2232 = vmatprep.mubr.msk.bf16.mxu0 %vm71_vm0, %v2575_v4  ;;  %v2607_v15 = vpack.c.bf16 %v27_v11, %v26_v10  ;;  %v2609_v16 = vpack.c.bf16 %v29_v13, %v28_v12  ;;  %v30_v17 = vld [vmem:[%s3003_s0 + $0x60] sm:$0xff]  ;;  %v31_v18 = vld [vmem:[%s3003_s0 + $0x68] sm:$0xff]  ;;  %v25_v19 = vld [vmem:[%s3003_s0 + $0x38] sm:$0xff] }
   0x6   :  { %2233 = vmatmul.mubr.msk.bf16.vlgmr.msra.gmra.mrb[0].mxu0 %vm71_vm0, %v2586_v8  ;;  %v2622_v20 = vpack.c.bf16 %v31_v18, %v30_v17  ;;  %v32_v21 = vld [vmem:[%s3003_s0 + $0x70] sm:$0xff]  ;;  %v33_v22 = vld [vmem:[%s3003_s0 + $0x78] sm:$0xff]  ;;  %v2501_v23 = vld [vmem:[%s3002_s2 + $0x8] sm:$0xff]   ;;  %v2644_v25 = vpack.c.bf16 %v25_v19, %v24_v14 }
   0x7   :  { %2236 = vmatprep.mubr.msk.bf16.mxu0 %vm71_vm0, %v2588_v9  ;;  %2240 = vmatprep.mubr.msk.bf16.mxu1 %vm71_vm0, %v2607_v15  ;;  %v2502_v24 = vld [vmem:[%s3002_s2 + $0x10] sm:$0xff]   ;;  %v2646_v26 = vpack.c.bf16 %v33_v22, %v32_v21  ;;  %v2503_v27 = vld [vmem:[%s3002_s2 + $0x18] sm:$0xff]   ;;  %v2504_v28 = vld [vmem:[%s3002_s2 + $0x20] sm:$0xff]  }
   0x8   :  { %2241 = vmatmul.mubr.msk.bf16.vlgmr.msra.gmra.mrb[0].mxu1 %vm71_vm0, %v2609_v16  ;;  %2248 = vmatprep.subr.bf16.mxu1 %v2501_v23  ;;  %v2505_v29 = vld [vmem:[%s3002_s2 + $0x28] sm:$0xff]   ;;  %v2506_v30 = vld [vmem:[%s3002_s2 + $0x30] sm:$0xff]   ;;  %v1969_v31 = vld [vmem:[%s3004_s3] ss:$0 sm:$0xff] }
   0x9   :  { %2244 = vmatprep.mubr.msk.bf16.mxu1 %vm71_vm0, %v2622_v20  ;;  %2249 = vmatpush3.bf16.msra.mxu1 %v2501_v23 }
   0xa   :  { %2250 = vmatprep.subr.bf16.mxu1 %v2502_v24  ;;  %2272 = vmatprep.subr.bf16.mxu0 %v2505_v29 }
   0xb   :  { %2273 = vmatpush3.bf16.msra.mxu0 %v2505_v29 }
   0xc   :  { %2274 = vmatprep.subr.bf16.mxu0 %v2506_v30 }
   0xd   :  { %2251 = vmatpush3.bf16.msra.mxu1 %v2502_v24 }
   0xe   :  { %2237 = vmatmul.mubr.msk.bf16.gmra.mrb[4].mxu0 %vm71_vm0, %v2644_v25  ;;  %2252 = vmatprep.subr.bf16.mxu1 %v2503_v27 }
   0xf   :  { %2275 = vmatpush3.bf16.msra.mxu0 %v2506_v30 }
  0x10   :  { %2245 = vmatmul.mubr.msk.bf16.gmra.mrb[4].mxu1 %vm71_vm0, %v2646_v26 }
  0x11   :  { %2253 = vmatpush3.bf16.msra.mxu1 %v2503_v27 }
  0x12   :  { %2254 = vmatprep.subr.bf16.mxu1 %v2504_v28 }
  0x15   :  { %2255 = vmatpush3.bf16.msra.mxu1 %v2504_v28 }
  0xd9   :  { %v2234_v32 = vpop.f32.mrb[0].mxu0 }
  0xda   :  { %v139_v33 = vadd.f32 %v2234_v32, %v1969_v31  ;;  %v130_v34 = vpop.f32.mrb[1].mxu0 }
  0xdb   :  { %v131_v35 = vadd.f32 %v1969_v31, %v130_v34  ;;  %v2235_v36 = vpop.f32.mrb[2].mxu0  ;;  %v2242_v37 = vpop.f32.mrb[0].mxu1  ;;  %v2509_v34 = vld [vmem:[%s3002_s2 + $0x48] sm:$0xff]  }
  0xdc   :  { %v142_v38 = vadd.f32 %v2235_v36, %v1969_v31  ;;  %v133_v39 = vpop.f32.mrb[3].mxu0  ;;  %v171_v40 = vadd.f32 %v2242_v37, %v1969_v31  ;;  %v162_v41 = vpop.f32.mrb[1].mxu1  ;;  %v195_v45 = vmax.f32 %v139_v33, 0.0  ;;  %v2508_v33 = vld [vmem:[%s3002_s2 + $0x40] sm:$0xff]   ;;  %2296 = vmatprep.subr.bf16.mxu1 %v2509_v34  ;;  %v2511_v36 = vld [vmem:[%s3002_s2 + $0x58] sm:$0xff]  }
  0xdd   :  { %v134_v42 = vadd.f32 %v1969_v31, %v133_v39  ;;  %v163_v43 = vadd.f32 %v1969_v31, %v162_v41  ;;  %v2243_v44 = vpop.f32.mrb[2].mxu1  ;;  %v193_v50 = vmax.f32 %v131_v35, 0.0  ;;  %v2510_v35 = vld [vmem:[%s3002_s2 + $0x50] sm:$0xff]   ;;  %v1979_v37 = vld [vmem:[%s3004_s3 + $0x1] ss:$0 sm:$0xff] }
  0xde   :  { %v196_v46 = vmax.f32 %v142_v38, 0.0  ;;  %v203_v47 = vmax.f32 %v171_v40, 0.0  ;;  %v174_v48 = vadd.f32 %v2243_v44, %v1969_v31  ;;  %v165_v49 = vpop.f32.mrb[3].mxu1 }
  0xdf   :  { %v194_v51 = vmax.f32 %v134_v42, 0.0  ;;  %v201_v52 = vmax.f32 %v163_v43, 0.0  ;;  %v166_v53 = vadd.f32 %v1969_v31, %v165_v49 }
  0xe0   :  { %v210_v54 = vpack.c.bf16 %v196_v46, %v195_v45  ;;  %v204_v55 = vmax.f32 %v174_v48, 0.0 }
  0xe1   :  { %v209_v56 = vpack.c.bf16 %v194_v51, %v193_v50  ;;  %v2238_v57 = vpop.f32.mrb[4].mxu0  ;;  %v202_v58 = vmax.f32 %v166_v53, 0.0 }
  0xe2   :  { %v155_v59 = vadd.f32 %v2238_v57, %v1969_v31  ;;  %v146_v60 = vpop.f32.mrb[5].mxu0  ;;  %v214_v61 = vpack.c.bf16 %v204_v55, %v203_v47 }
  0xe3   :  { %v147_v62 = vadd.f32 %v1969_v31, %v146_v60  ;;  %v2239_v63 = vpop.f32.mrb[6].mxu0  ;;  %2256 = vmatprep.mubr.msk.bf16.mxu1 %vm254_vm1, %v209_v56  ;;  %v213_v0 = vpack.c.bf16 %v202_v58, %v201_v52  ;;  %v2246_v1 = vpop.f32.mrb[4].mxu1 }
  0xe4   :  { %v158_v2 = vadd.f32 %v2239_v63, %v1969_v31  ;;  %v149_v3 = vpop.f32.mrb[7].mxu0  ;;  %2257 = vmatmul.mubr.msk.bf16.vlgmr.msra.gmra.mrb[8].mxu1 %vm254_vm1, %v210_v54  ;;  %v187_v5 = vadd.f32 %v2246_v1, %v1969_v31  ;;  %v178_v6 = vpop.f32.mrb[5].mxu1  ;;  %v199_v12 = vmax.f32 %v155_v59, 0.0 }
  0xe5   :  { %v150_v7 = vadd.f32 %v1969_v31, %v149_v3  ;;  %v179_v10 = vadd.f32 %v1969_v31, %v178_v6  ;;  %v2247_v11 = vpop.f32.mrb[6].mxu1  ;;  %v197_v19 = vmax.f32 %v147_v62, 0.0  ;;  %2297 = vmatpush3.bf16.msra.mxu1 %v2509_v34 }
  0xe6   :  { %v200_v13 = vmax.f32 %v158_v2, 0.0  ;;  %v207_v14 = vmax.f32 %v187_v5, 0.0  ;;  %v190_v17 = vadd.f32 %v2247_v11, %v1969_v31  ;;  %v181_v18 = vpop.f32.mrb[7].mxu1  ;;  %2298 = vmatprep.subr.bf16.mxu1 %v2510_v35 }
  0xe7   :  { %v198_v21 = vmax.f32 %v150_v7, 0.0  ;;  %v205_v22 = vmax.f32 %v179_v10, 0.0  ;;  %v182_v23 = vadd.f32 %v1969_v31, %v181_v18  ;;  %v2507_v31 = vld [vmem:[%s3002_s2 + $0x38] sm:$0xff]  }
  0xe8   :  { %v212_v24 = vpack.c.bf16 %v200_v13, %v199_v12  ;;  %v208_v27 = vmax.f32 %v190_v17, 0.0  ;;  %2276 = vmatprep.subr.bf16.mxu0 %v2507_v31 }
  0xe9   :  { %v211_v28 = vpack.c.bf16 %v198_v21, %v197_v19  ;;  %v206_v29 = vmax.f32 %v182_v23, 0.0  ;;  %2277 = vmatpush3.bf16.msra.mxu0 %v2507_v31  ;;  %2299 = vmatpush3.bf16.msra.mxu1 %v2510_v35 }
  0xea   :  { %v216_v30 = vpack.c.bf16 %v208_v27, %v207_v14  ;;  %2278 = vmatprep.subr.bf16.mxu0 %v2508_v33  ;;  %2300 = vmatprep.subr.bf16.mxu1 %v2511_v36 }
  0xeb   :  { %2260 = vmatprep.mubr.msk.bf16.mxu1 %vm254_vm1, %v211_v28  ;;  %v215_v32 = vpack.c.bf16 %v206_v29, %v205_v22 }
  0xec   :  { %2261 = vmatmul.mubr.msk.bf16.gmra.mrb[12].mxu1 %vm254_vm1, %v212_v24 }
  0xed   :  { %2264 = vmatprep.mubr.msk.bf16.mxu1 %vm254_vm1, %v213_v0  ;;  %2279 = vmatpush3.bf16.msra.mxu0 %v2508_v33 }
  0xee   :  { %2301 = vmatpush3.bf16.msra.mxu1 %v2511_v36 }
  0xf4   :  { %2265 = vmatmul.mubr.msk.bf16.gmra.mrb[16].mxu1 %vm254_vm1, %v214_v61 }
  0xf5   :  { %2268 = vmatprep.mubr.msk.bf16.mxu1 %vm254_vm1, %v215_v32 }
  0xfc   :  { %2269 = vmatmul.mubr.msk.bf16.gmra.mrb[20].mxu1 %vm254_vm1, %v216_v30 }
 0x1b7   :  { %v2258_v38 = vpop.f32.mrb[8].mxu1 }
 0x1b8   :  { %v322_v39 = vadd.f32 %v2258_v38, %v1979_v37  ;;  %v313_v40 = vpop.f32.mrb[9].mxu1 }
 0x1b9   :  { %v314_v41 = vadd.f32 %v1979_v37, %v313_v40  ;;  %v2259_v42 = vpop.f32.mrb[10].mxu1  ;;  %v2514_v40 = vld [vmem:[%s3002_s2 + $0x78] sm:$0xff]  }
 0x1ba   :  { %v325_v43 = vadd.f32 %v2259_v42, %v1979_v37  ;;  %v316_v44 = vpop.f32.mrb[11].mxu1  ;;  %v378_v46 = vmax.f32 %v322_v39, 0.0  ;;  %v2512_v39 = vld [vmem:[%s3002_s2 + $0x60] sm:$0xff]  }
 0x1bb   :  { %v317_v45 = vadd.f32 %v1979_v37, %v316_v44  ;;  %v376_v48 = vmax.f32 %v314_v41, 0.0  ;;  %2302 = vmatprep.subr.bf16.mxu1 %v2512_v39  ;;  %v2515_v41 = vld [vmem:[%s3002_s2 + $0x80] sm:$0xff]  }
 0x1bc   :  { %v379_v47 = vmax.f32 %v325_v43, 0.0  ;;  %2303 = vmatpush3.bf16.msra.mxu1 %v2512_v39  ;;  %v1992_v42 = vld [vmem:[%s3004_s3 + $0x2] ss:$0 sm:$0xff] }
 0x1bd   :  { %v377_v49 = vmax.f32 %v317_v45, 0.0 }
 0x1be   :  { %v393_v50 = vpack.c.bf16 %v379_v47, %v378_v46 }
 0x1bf   :  { %v392_v51 = vpack.c.bf16 %v377_v49, %v376_v48  ;;  %v2262_v52 = vpop.f32.mrb[12].mxu1 }
 0x1c0   :  { %v338_v53 = vadd.f32 %v2262_v52, %v1979_v37  ;;  %v329_v54 = vpop.f32.mrb[13].mxu1 }
 0x1c1   :  { %v330_v55 = vadd.f32 %v1979_v37, %v329_v54  ;;  %v2263_v56 = vpop.f32.mrb[14].mxu1  ;;  %2280 = vmatprep.mubr.msk.bf16.mxu0 %vm254_vm1, %v392_v51 }
 0x1c2   :  { %v341_v57 = vadd.f32 %v2263_v56, %v1979_v37  ;;  %v332_v58 = vpop.f32.mrb[15].mxu1  ;;  %2281 = vmatmul.mubr.msk.bf16.vlgmr.msra.gmra.mrb[8].mxu0 %vm254_vm1, %v393_v50  ;;  %v382_v60 = vmax.f32 %v338_v53, 0.0 }
 0x1c3   :  { %v333_v59 = vadd.f32 %v1979_v37, %v332_v58  ;;  %v380_v62 = vmax.f32 %v330_v55, 0.0 }
 0x1c4   :  { %v383_v61 = vmax.f32 %v341_v57, 0.0 }
 0x1c5   :  { %v381_v63 = vmax.f32 %v333_v59, 0.0 }
 0x1c6   :  { %v395_v0 = vpack.c.bf16 %v383_v61, %v382_v60 }
 0x1c7   :  { %v394_v1 = vpack.c.bf16 %v381_v63, %v380_v62  ;;  %v2266_v2 = vpop.f32.mrb[16].mxu1 }
 0x1c8   :  { %v354_v3 = vadd.f32 %v2266_v2, %v1979_v37  ;;  %v345_v5 = vpop.f32.mrb[17].mxu1 }
 0x1c9   :  { %v346_v6 = vadd.f32 %v1979_v37, %v345_v5  ;;  %v2267_v7 = vpop.f32.mrb[18].mxu1  ;;  %2284 = vmatprep.mubr.msk.bf16.mxu0 %vm254_vm1, %v394_v1 }
 0x1ca   :  { %v357_v10 = vadd.f32 %v2267_v7, %v1979_v37  ;;  %v348_v11 = vpop.f32.mrb[19].mxu1  ;;  %2285 = vmatmul.mubr.msk.bf16.gmra.mrb[12].mxu0 %vm254_vm1, %v395_v0  ;;  %v386_v13 = vmax.f32 %v354_v3, 0.0 }
 0x1cb   :  { %v349_v12 = vadd.f32 %v1979_v37, %v348_v11  ;;  %v384_v17 = vmax.f32 %v346_v6, 0.0 }
 0x1cc   :  { %v387_v14 = vmax.f32 %v357_v10, 0.0 }
 0x1cd   :  { %v385_v18 = vmax.f32 %v349_v12, 0.0 }
 0x1ce   :  { %v397_v19 = vpack.c.bf16 %v387_v14, %v386_v13 }
 0x1cf   :  { %v396_v21 = vpack.c.bf16 %v385_v18, %v384_v17  ;;  %v2270_v22 = vpop.f32.mrb[20].mxu1 }
 0x1d0   :  { %v370_v23 = vadd.f32 %v2270_v22, %v1979_v37  ;;  %v361_v24 = vpop.f32.mrb[21].mxu1 }
 0x1d1   :  { %v362_v27 = vadd.f32 %v1979_v37, %v361_v24  ;;  %v2271_v28 = vpop.f32.mrb[22].mxu1  ;;  %2288 = vmatprep.mubr.msk.bf16.mxu0 %vm254_vm1, %v396_v21 }
 0x1d2   :  { %v373_v29 = vadd.f32 %v2271_v28, %v1979_v37  ;;  %v364_v30 = vpop.f32.mrb[23].mxu1  ;;  %2289 = vmatmul.mubr.msk.bf16.gmra.mrb[16].mxu0 %vm254_vm1, %v397_v19  ;;  %v390_v31 = vmax.f32 %v370_v23, 0.0 }
 0x1d3   :  { %v365_v32 = vadd.f32 %v1979_v37, %v364_v30  ;;  %v388_v34 = vmax.f32 %v362_v27, 0.0  ;;  %v2513_v37 = vld [vmem:[%s3002_s2 + $0x70] sm:$0xff]  }
 0x1d4   :  { %v391_v33 = vmax.f32 %v373_v29, 0.0  ;;  %2320 = vmatprep.subr.bf16.mxu0 %v2513_v37 }
 0x1d5   :  { %v389_v35 = vmax.f32 %v365_v32, 0.0  ;;  %2321 = vmatpush3.bf16.msra.mxu0 %v2513_v37 }
 0x1d6   :  { %v399_v36 = vpack.c.bf16 %v391_v33, %v390_v31  ;;  %2322 = vmatprep.subr.bf16.mxu0 %v2514_v40 }
 0x1d7   :  { %v398_v38 = vpack.c.bf16 %v389_v35, %v388_v34 }
 0x1d9   :  { %2292 = vmatprep.mubr.msk.bf16.mxu0 %vm254_vm1, %v398_v38  ;;  %2323 = vmatpush3.bf16.msra.mxu0 %v2514_v40 }
 0x1da   :  { %2293 = vmatmul.mubr.msk.bf16.gmra.mrb[20].mxu0 %vm254_vm1, %v399_v36  ;;  %2324 = vmatprep.subr.bf16.mxu0 %v2515_v41 }
 0x1dd   :  { %2325 = vmatpush3.bf16.msra.mxu0 %v2515_v41 }
 0x295   :  { %v2282_v43 = vpop.f32.mrb[8].mxu0 }
 0x296   :  { %v504_v44 = vadd.f32 %v2282_v43, %v1992_v42  ;;  %v495_v45 = vpop.f32.mrb[9].mxu0 }
 0x297   :  { %v496_v46 = vadd.f32 %v1992_v42, %v495_v45  ;;  %v2283_v47 = vpop.f32.mrb[10].mxu0  ;;  %v2518_v45 = vld [vmem:[%s3002_s2 + $0x90] sm:$0xff]  }
 0x298   :  { %v507_v48 = vadd.f32 %v2283_v47, %v1992_v42  ;;  %v498_v49 = vpop.f32.mrb[11].mxu0  ;;  %v560_v51 = vmax.f32 %v504_v44, 0.0  ;;  %v2516_v44 = vld [vmem:[%s3002_s2 + $0x88] sm:$0xff]   ;;  %2362 = vmatprep.subr.bf16.mxu1 %v2518_v45  ;;  %v2520_v47 = vld [vmem:[%s3002_s2 + $0xa0] sm:$0xff]  }
 0x299   :  { %v499_v50 = vadd.f32 %v1992_v42, %v498_v49  ;;  %v558_v53 = vmax.f32 %v496_v46, 0.0  ;;  %2326 = vmatprep.subr.bf16.mxu0 %v2516_v44  ;;  %v2519_v46 = vld [vmem:[%s3002_s2 + $0x98] sm:$0xff]  }
 0x29a   :  { %v561_v52 = vmax.f32 %v507_v48, 0.0  ;;  %2327 = vmatpush3.bf16.msra.mxu0 %v2516_v44  ;;  %v2005_v48 = vld [vmem:[%s3004_s3 + $0x3] ss:$0 sm:$0xff] }
 0x29b   :  { %v559_v54 = vmax.f32 %v499_v50, 0.0 }
 0x29c   :  { %v575_v55 = vpack.c.bf16 %v561_v52, %v560_v51 }
 0x29d   :  { %v574_v56 = vpack.c.bf16 %v559_v54, %v558_v53  ;;  %v2286_v57 = vpop.f32.mrb[12].mxu0 }
 0x29e   :  { %v520_v58 = vadd.f32 %v2286_v57, %v1992_v42  ;;  %v511_v59 = vpop.f32.mrb[13].mxu0 }
 0x29f   :  { %v512_v60 = vadd.f32 %v1992_v42, %v511_v59  ;;  %v2287_v61 = vpop.f32.mrb[14].mxu0  ;;  %2304 = vmatprep.mubr.msk.bf16.mxu1 %vm254_vm1, %v574_v56 }
 0x2a0   :  { %v523_v62 = vadd.f32 %v2287_v61, %v1992_v42  ;;  %v514_v63 = vpop.f32.mrb[15].mxu0  ;;  %2305 = vmatmul.mubr.msk.bf16.vlgmr.msra.gmra.mrb[24].mxu1 %vm254_vm1, %v575_v55  ;;  %v564_v1 = vmax.f32 %v520_v58, 0.0 }
 0x2a1   :  { %v515_v0 = vadd.f32 %v1992_v42, %v514_v63  ;;  %v562_v3 = vmax.f32 %v512_v60, 0.0  ;;  %2363 = vmatpush3.bf16.msra.mxu1 %v2518_v45 }
 0x2a2   :  { %v565_v2 = vmax.f32 %v523_v62, 0.0  ;;  %2364 = vmatprep.subr.bf16.mxu1 %v2519_v46 }
 0x2a3   :  { %v563_v5 = vmax.f32 %v515_v0, 0.0 }
 0x2a4   :  { %v577_v6 = vpack.c.bf16 %v565_v2, %v564_v1 }
 0x2a5   :  { %v576_v7 = vpack.c.bf16 %v563_v5, %v562_v3  ;;  %v2290_v10 = vpop.f32.mrb[16].mxu0  ;;  %2365 = vmatpush3.bf16.msra.mxu1 %v2519_v46 }
 0x2a6   :  { %v536_v11 = vadd.f32 %v2290_v10, %v1992_v42  ;;  %v527_v12 = vpop.f32.mrb[17].mxu0  ;;  %2366 = vmatprep.subr.bf16.mxu1 %v2520_v47 }
 0x2a7   :  { %v528_v13 = vadd.f32 %v1992_v42, %v527_v12  ;;  %v2291_v14 = vpop.f32.mrb[18].mxu0  ;;  %2308 = vmatprep.mubr.msk.bf16.mxu1 %vm254_vm1, %v576_v7 }
 0x2a8   :  { %v539_v17 = vadd.f32 %v2291_v14, %v1992_v42  ;;  %v530_v18 = vpop.f32.mrb[19].mxu0  ;;  %2309 = vmatmul.mubr.msk.bf16.gmra.mrb[28].mxu1 %vm254_vm1, %v577_v6  ;;  %v568_v21 = vmax.f32 %v536_v11, 0.0 }
 0x2a9   :  { %v531_v19 = vadd.f32 %v1992_v42, %v530_v18  ;;  %v566_v23 = vmax.f32 %v528_v13, 0.0  ;;  %2367 = vmatpush3.bf16.msra.mxu1 %v2520_v47 }
 0x2aa   :  { %v569_v22 = vmax.f32 %v539_v17, 0.0 }
 0x2ab   :  { %v567_v24 = vmax.f32 %v531_v19, 0.0 }
 0x2ac   :  { %v579_v27 = vpack.c.bf16 %v569_v22, %v568_v21 }
 0x2ad   :  { %v578_v28 = vpack.c.bf16 %v567_v24, %v566_v23  ;;  %v2294_v29 = vpop.f32.mrb[20].mxu0 }
 0x2ae   :  { %v552_v30 = vadd.f32 %v2294_v29, %v1992_v42  ;;  %v543_v32 = vpop.f32.mrb[21].mxu0 }
 0x2af   :  { %v544_v31 = vadd.f32 %v1992_v42, %v543_v32  ;;  %v2295_v33 = vpop.f32.mrb[22].mxu0  ;;  %2312 = vmatprep.mubr.msk.bf16.mxu1 %vm254_vm1, %v578_v28 }
 0x2b0   :  { %v555_v34 = vadd.f32 %v2295_v33, %v1992_v42  ;;  %v546_v35 = vpop.f32.mrb[23].mxu0  ;;  %2313 = vmatmul.mubr.msk.bf16.gmra.mrb[32].mxu1 %vm254_vm1, %v579_v27  ;;  %v572_v38 = vmax.f32 %v552_v30, 0.0 }
 0x2b1   :  { %v547_v36 = vadd.f32 %v1992_v42, %v546_v35  ;;  %v570_v37 = vmax.f32 %v544_v31, 0.0  ;;  %v2517_v42 = vld [vmem:[%s3002_s2 + $0x68] sm:$0xff]  }
 0x2b2   :  { %v573_v39 = vmax.f32 %v555_v34, 0.0  ;;  %2344 = vmatprep.subr.bf16.mxu0 %v2517_v42 }
 0x2b3   :  { %v571_v40 = vmax.f32 %v547_v36, 0.0 }
 0x2b4   :  { %v581_v41 = vpack.c.bf16 %v573_v39, %v572_v38 }
 0x2b5   :  { %v580_v43 = vpack.c.bf16 %v571_v40, %v570_v37 }
 0x2b7   :  { %2316 = vmatprep.mubr.msk.bf16.mxu1 %vm254_vm1, %v580_v43 }
 0x2b8   :  { %2317 = vmatmul.mubr.msk.bf16.gmra.mrb[36].mxu1 %vm254_vm1, %v581_v41 }
 0x373   :  { %v2306_v49 = vpop.f32.mrb[24].mxu1 }
 0x374   :  { %v686_v50 = vadd.f32 %v2306_v49, %v2005_v48  ;;  %v677_v51 = vpop.f32.mrb[25].mxu1 }
 0x375   :  { %v678_v52 = vadd.f32 %v2005_v48, %v677_v51  ;;  %v2307_v53 = vpop.f32.mrb[26].mxu1 }
 0x376   :  { %v689_v54 = vadd.f32 %v2307_v53, %v2005_v48  ;;  %v680_v55 = vpop.f32.mrb[27].mxu1  ;;  %v742_v57 = vmax.f32 %v686_v50, 0.0 }
 0x377   :  { %v681_v56 = vadd.f32 %v2005_v48, %v680_v55  ;;  %v740_v59 = vmax.f32 %v678_v52, 0.0 }
 0x378   :  { %v743_v58 = vmax.f32 %v689_v54, 0.0 }
 0x379   :  { %v741_v60 = vmax.f32 %v681_v56, 0.0 }
 0x37a   :  { %v759_v61 = vpack.c.bf16 %v743_v58, %v742_v57 }
 0x37b   :  { %v758_v62 = vpack.c.bf16 %v741_v60, %v740_v59  ;;  %v2310_v63 = vpop.f32.mrb[28].mxu1 }
 0x37c   :  { %v702_v0 = vadd.f32 %v2310_v63, %v2005_v48  ;;  %v693_v1 = vpop.f32.mrb[29].mxu1 }
 0x37d   :  { %v694_v2 = vadd.f32 %v2005_v48, %v693_v1  ;;  %v2311_v3 = vpop.f32.mrb[30].mxu1  ;;  %2328 = vmatprep.mubr.msk.bf16.mxu0 %vm254_vm1, %v758_v62 }
 0x37e   :  { %v705_v5 = vadd.f32 %v2311_v3, %v2005_v48  ;;  %v696_v6 = vpop.f32.mrb[31].mxu1  ;;  %2329 = vmatmul.mubr.msk.bf16.vlgmr.msra.gmra.mrb[24].mxu0 %vm254_vm1, %v759_v61  ;;  %v746_v10 = vmax.f32 %v702_v0, 0.0  ;;  %v2523_v61 = vld [vmem:[%s3002_s2 + $0xb8] sm:$0xff]  }
 0x37f   :  { %v697_v7 = vadd.f32 %v2005_v48, %v696_v6  ;;  %2345 = vmatpush3.bf16.msra.mxu0 %v2517_v42  ;;  %v744_v12 = vmax.f32 %v694_v2, 0.0  ;;  %v2524_v6 = vld [vmem:[%s3002_s2 + $0xc0] sm:$0xff]  }
 0x380   :  { %v747_v11 = vmax.f32 %v705_v5, 0.0 }
 0x381   :  { %v745_v13 = vmax.f32 %v697_v7, 0.0 }
 0x382   :  { %v761_v14 = vpack.c.bf16 %v747_v11, %v746_v10 }
 0x383   :  { %v760_v17 = vpack.c.bf16 %v745_v13, %v744_v12  ;;  %v2314_v18 = vpop.f32.mrb[32].mxu1 }
 0x384   :  { %v718_v19 = vadd.f32 %v2314_v18, %v2005_v48  ;;  %v709_v21 = vpop.f32.mrb[33].mxu1 }
 0x385   :  { %v710_v22 = vadd.f32 %v2005_v48, %v709_v21  ;;  %v2315_v23 = vpop.f32.mrb[34].mxu1  ;;  %2332 = vmatprep.mubr.msk.bf16.mxu0 %vm254_vm1, %v760_v17 }
 0x386   :  { %v721_v24 = vadd.f32 %v2315_v23, %v2005_v48  ;;  %v712_v27 = vpop.f32.mrb[35].mxu1  ;;  %2333 = vmatmul.mubr.msk.bf16.gmra.mrb[28].mxu0 %vm254_vm1, %v761_v14  ;;  %v750_v29 = vmax.f32 %v718_v19, 0.0 }
 0x387   :  { %v713_v28 = vadd.f32 %v2005_v48, %v712_v27  ;;  %v748_v32 = vmax.f32 %v710_v22, 0.0 }
 0x388   :  { %v751_v30 = vmax.f32 %v721_v24, 0.0 }
 0x389   :  { %v749_v31 = vmax.f32 %v713_v28, 0.0 }
 0x38a   :  { %v763_v33 = vpack.c.bf16 %v751_v30, %v750_v29 }
 0x38b   :  { %v762_v34 = vpack.c.bf16 %v749_v31, %v748_v32  ;;  %v2318_v35 = vpop.f32.mrb[36].mxu1 }
 0x38c   :  { %v734_v36 = vadd.f32 %v2318_v35, %v2005_v48  ;;  %v725_v38 = vpop.f32.mrb[37].mxu1 }
 0x38d   :  { %v726_v39 = vadd.f32 %v2005_v48, %v725_v38  ;;  %v2319_v37 = vpop.f32.mrb[38].mxu1  ;;  %2336 = vmatprep.mubr.msk.bf16.mxu0 %vm254_vm1, %v762_v34 }
 0x38e   :  { %v737_v40 = vadd.f32 %v2319_v37, %v2005_v48  ;;  %v728_v41 = vpop.f32.mrb[39].mxu1  ;;  %2337 = vmatmul.mubr.msk.bf16.gmra.mrb[32].mxu0 %vm254_vm1, %v763_v33  ;;  %v754_v44 = vmax.f32 %v734_v36, 0.0 }
 0x38f   :  { %v729_v43 = vadd.f32 %v2005_v48, %v728_v41  ;;  %v752_v45 = vmax.f32 %v726_v39, 0.0 }
 0x390   :  { %v755_v42 = vmax.f32 %v737_v40, 0.0 }
 0x391   :  { %v753_v46 = vmax.f32 %v729_v43, 0.0 }
 0x392   :  { %v765_v47 = vpack.c.bf16 %v755_v42, %v754_v44 }
 0x393   :  { %v764_v49 = vpack.c.bf16 %v753_v46, %v752_v45  ;;  %v2525_v46 = vld [vmem:[%s3002_s2 + $0xc8] sm:$0xff]  }
 0x395   :  { %2340 = vmatprep.mubr.msk.bf16.mxu0 %vm254_vm1, %v764_v49  ;;  %v2527_v49 = vld [vmem:[%s3002_s2 + $0xd8] sm:$0xff]  }
 0x396   :  { %2341 = vmatmul.mubr.msk.bf16.gmra.mrb[36].mxu0 %vm254_vm1, %v765_v47  ;;  %v2526_v47 = vld [vmem:[%s3002_s2 + $0xd0] sm:$0xff]  }
 0x397   :  { %2346 = vmatprep.mubr.msk.bf16.mxu0 %vm71_vm0, %v2575_v4  ;;  %v2521_v4 = vld [vmem:[%s3002_s2 + $0xa8] sm:$0xff]   ;;  %2410 = vmatprep.subr.bf16.mxu0 %v2526_v47 }
 0x398   :  { %2368 = vmatprep.subr.bf16.mxu1 %v2521_v4 }
 0x399   :  { %2369 = vmatpush3.bf16.msra.mxu1 %v2521_v4  ;;  %v2528_v4 = vld [vmem:[%s3002_s2 + $0xe0] sm:$0xff]  }
 0x39e   :  { %2347 = vmatmul.mubr.msk.bf16.vlgmr.msra.gmra.mrb[24].mxu0 %vm71_vm0, %v2586_v8  ;;  %v2522_v8 = vld [vmem:[%s3002_s2 + $0xb0] sm:$0xff]  }
 0x39f   :  { %2350 = vmatprep.mubr.msk.bf16.mxu0 %vm71_vm0, %v2588_v9  ;;  %2386 = vmatprep.subr.bf16.mxu1 %v2522_v8  ;;  %v2775_v9 = vld [vmem:[%s3004_s3 + $0x4] ss:$0 sm:$0xff] }
 0x3a0   :  { %2411 = vmatpush3.bf16.msra.mxu0 %v2526_v47 }
 0x3a1   :  { %2412 = vmatprep.subr.bf16.mxu0 %v2527_v49 }
 0x3a4   :  { %2413 = vmatpush3.bf16.msra.mxu0 %v2527_v49  ;;  %v2053_v49 = vld [vmem:[%s3004_s3 + $0x6] ss:$0 sm:$0xff] }
 0x3a5   :  { %2414 = vmatprep.subr.bf16.mxu0 %v2528_v4 }
 0x3a6   :  { %2351 = vmatmul.mubr.msk.bf16.gmra.mrb[28].mxu0 %vm71_vm0, %v2644_v25 }
 0x3a7   :  { %2354 = vmatprep.mubr.msk.bf16.mxu0 %vm71_vm0, %v2607_v15 }
 0x3a8   :  { %2415 = vmatpush3.bf16.msra.mxu0 %v2528_v4 }
 0x3ae   :  { %2355 = vmatmul.mubr.msk.bf16.gmra.mrb[32].mxu0 %vm71_vm0, %v2609_v16 }
 0x3af   :  { %2358 = vmatprep.mubr.msk.bf16.mxu0 %vm71_vm0, %v2622_v20 }
 0x3b6   :  { %2359 = vmatmul.mubr.msk.bf16.gmra.mrb[36].mxu0 %vm71_vm0, %v2646_v26 }
 0x471   :  { %v2348_v15 = vpop.f32.mrb[24].mxu0 }
 0x472   :  { %v1029_v16 = vadd.f32 %v2348_v15, %v2775_v9  ;;  %v959_v20 = vpop.f32.mrb[25].mxu0 }
 0x473   :  { %v1027_v25 = vadd.f32 %v2775_v9, %v959_v20  ;;  %v2349_v26 = vpop.f32.mrb[26].mxu0 }
 0x474   :  { %v1030_v48 = vadd.f32 %v2349_v26, %v2775_v9  ;;  %v962_v50 = vpop.f32.mrb[27].mxu0  ;;  %v1045_v52 = vmax.f32 %v1029_v16, 0.0 }
 0x475   :  { %v1028_v51 = vadd.f32 %v2775_v9, %v962_v50  ;;  %v1043_v54 = vmax.f32 %v1027_v25, 0.0 }
 0x476   :  { %v1046_v53 = vmax.f32 %v1030_v48, 0.0 }
 0x477   :  { %v1044_v55 = vmax.f32 %v1028_v51, 0.0 }
 0x478   :  { %v1060_v56 = vpack.c.bf16 %v1046_v53, %v1045_v52 }
 0x479   :  { %v1059_v57 = vpack.c.bf16 %v1044_v55, %v1043_v54  ;;  %v2352_v58 = vpop.f32.mrb[28].mxu0 }
 0x47a   :  { %v1033_v59 = vadd.f32 %v2352_v58, %v2775_v9  ;;  %v975_v60 = vpop.f32.mrb[29].mxu0 }
 0x47b   :  { %v1031_v62 = vadd.f32 %v2775_v9, %v975_v60  ;;  %v2353_v63 = vpop.f32.mrb[30].mxu0  ;;  %2370 = vmatprep.mubr.msk.bf16.mxu1 %vm254_vm1, %v1059_v57 }
 0x47c   :  { %v1034_v0 = vadd.f32 %v2353_v63, %v2775_v9  ;;  %v978_v1 = vpop.f32.mrb[31].mxu0  ;;  %2371 = vmatmul.mubr.msk.bf16.vlgmr.msra.gmra.mrb[40].mxu1 %vm254_vm1, %v1060_v56  ;;  %v1049_v3 = vmax.f32 %v1033_v59, 0.0 }
 0x47d   :  { %v1032_v2 = vadd.f32 %v2775_v9, %v978_v1  ;;  %2387 = vmatpush3.bf16.msra.mxu1 %v2522_v8  ;;  %v1047_v7 = vmax.f32 %v1031_v62, 0.0  ;;  %v2040_v8 = vld [vmem:[%s3004_s3 + $0x5] ss:$0 sm:$0xff] }
 0x47e   :  { %v1050_v5 = vmax.f32 %v1034_v0, 0.0  ;;  %2388 = vmatprep.subr.bf16.mxu1 %v2523_v61 }
 0x47f   :  { %v1048_v10 = vmax.f32 %v1032_v2, 0.0 }
 0x480   :  { %v1062_v11 = vpack.c.bf16 %v1050_v5, %v1049_v3 }
 0x481   :  { %v1061_v12 = vpack.c.bf16 %v1048_v10, %v1047_v7  ;;  %v2356_v13 = vpop.f32.mrb[32].mxu0  ;;  %2389 = vmatpush3.bf16.msra.mxu1 %v2523_v61 }
 0x482   :  { %v1037_v14 = vadd.f32 %v2356_v13, %v2775_v9  ;;  %v991_v17 = vpop.f32.mrb[33].mxu0  ;;  %2390 = vmatprep.subr.bf16.mxu1 %v2524_v6 }
 0x483   :  { %v1035_v18 = vadd.f32 %v2775_v9, %v991_v17  ;;  %v2357_v19 = vpop.f32.mrb[34].mxu0  ;;  %2374 = vmatprep.mubr.msk.bf16.mxu1 %vm254_vm1, %v1061_v12 }
 0x484   :  { %v1038_v21 = vadd.f32 %v2357_v19, %v2775_v9  ;;  %v994_v22 = vpop.f32.mrb[35].mxu0  ;;  %2375 = vmatmul.mubr.msk.bf16.gmra.mrb[44].mxu1 %vm254_vm1, %v1062_v11  ;;  %v1053_v24 = vmax.f32 %v1037_v14, 0.0 }
 0x485   :  { %v1036_v23 = vadd.f32 %v2775_v9, %v994_v22  ;;  %2391 = vmatpush3.bf16.msra.mxu1 %v2524_v6  ;;  %v1051_v28 = vmax.f32 %v1035_v18, 0.0 }
 0x486   :  { %v1054_v27 = vmax.f32 %v1038_v21, 0.0  ;;  %2392 = vmatprep.subr.bf16.mxu1 %v2525_v46 }
 0x487   :  { %v1052_v29 = vmax.f32 %v1036_v23, 0.0 }
 0x488   :  { %v1064_v30 = vpack.c.bf16 %v1054_v27, %v1053_v24 }
 0x489   :  { %v1063_v32 = vpack.c.bf16 %v1052_v29, %v1051_v28  ;;  %v2360_v31 = vpop.f32.mrb[36].mxu0  ;;  %2393 = vmatpush3.bf16.msra.mxu1 %v2525_v46  ;;  %v2532_v46 = vld [vmem:[%s3002_s2 + $0x100] sm:$0xff]  }
 0x48a   :  { %v1041_v33 = vadd.f32 %v2360_v31, %v2775_v9  ;;  %v1007_v34 = vpop.f32.mrb[37].mxu0 }
 0x48b   :  { %v1039_v35 = vadd.f32 %v2775_v9, %v1007_v34  ;;  %v2361_v36 = vpop.f32.mrb[38].mxu0  ;;  %2378 = vmatprep.mubr.msk.bf16.mxu1 %vm254_vm1, %v1063_v32 }
 0x48c   :  { %v1042_v38 = vadd.f32 %v2361_v36, %v2775_v9  ;;  %v1010_v39 = vpop.f32.mrb[39].mxu0  ;;  %2379 = vmatmul.mubr.msk.bf16.gmra.mrb[48].mxu1 %vm254_vm1, %v1064_v30  ;;  %v1057_v40 = vmax.f32 %v1041_v33, 0.0 }
 0x48d   :  { %v1040_v37 = vadd.f32 %v2775_v9, %v1010_v39  ;;  %v1055_v43 = vmax.f32 %v1039_v35, 0.0 }
 0x48e   :  { %v1058_v41 = vmax.f32 %v1042_v38, 0.0 }
 0x48f   :  { %v1056_v44 = vmax.f32 %v1040_v37, 0.0 }
 0x490   :  { %v1066_v42 = vpack.c.bf16 %v1058_v41, %v1057_v40 }
 0x491   :  { %v1065_v45 = vpack.c.bf16 %v1056_v44, %v1055_v43  ;;  %v2529_v44 = vld [vmem:[%s3002_s2 + $0xe8] sm:$0xff]  }
 0x492   :  { %2416 = vmatprep.subr.bf16.mxu0 %v2529_v44 }
 0x493   :  { %2382 = vmatprep.mubr.msk.bf16.mxu1 %vm254_vm1, %v1065_v45  ;;  %2417 = vmatpush3.bf16.msra.mxu0 %v2529_v44  ;;  %v2531_v45 = vld [vmem:[%s3002_s2 + $0xf8] sm:$0xff]  }
 0x494   :  { %2383 = vmatmul.mubr.msk.bf16.gmra.mrb[52].mxu1 %vm254_vm1, %v1066_v42  ;;  %v2530_v42 = vld [vmem:[%s3002_s2 + $0xf0] sm:$0xff]  }
 0x495   :  { %2434 = vmatprep.subr.bf16.mxu1 %v2530_v42 }
 0x54f   :  { %v2372_v9 = vpop.f32.mrb[40].mxu1 }
 0x550   :  { %v1171_v15 = vadd.f32 %v2372_v9, %v2040_v8  ;;  %v1162_v16 = vpop.f32.mrb[41].mxu1 }
 0x551   :  { %v1163_v20 = vadd.f32 %v2040_v8, %v1162_v16  ;;  %v2373_v25 = vpop.f32.mrb[42].mxu1 }
 0x552   :  { %v1174_v26 = vadd.f32 %v2373_v25, %v2040_v8  ;;  %v1165_v48 = vpop.f32.mrb[43].mxu1  ;;  %v1227_v51 = vmax.f32 %v1171_v15, 0.0 }
 0x553   :  { %v1166_v50 = vadd.f32 %v2040_v8, %v1165_v48  ;;  %v1225_v53 = vmax.f32 %v1163_v20, 0.0 }
 0x554   :  { %v1228_v52 = vmax.f32 %v1174_v26, 0.0 }
 0x555   :  { %v1226_v54 = vmax.f32 %v1166_v50, 0.0 }
 0x556   :  { %v1242_v55 = vpack.c.bf16 %v1228_v52, %v1227_v51 }
 0x557   :  { %v1241_v56 = vpack.c.bf16 %v1226_v54, %v1225_v53  ;;  %v2376_v57 = vpop.f32.mrb[44].mxu1 }
 0x558   :  { %v1187_v58 = vadd.f32 %v2376_v57, %v2040_v8  ;;  %v1178_v59 = vpop.f32.mrb[45].mxu1 }
 0x559   :  { %v1179_v60 = vadd.f32 %v2040_v8, %v1178_v59  ;;  %v2377_v61 = vpop.f32.mrb[46].mxu1  ;;  %2394 = vmatprep.mubr.msk.bf16.mxu1 %vm254_vm1, %v1241_v56 }
 0x55a   :  { %v1190_v62 = vadd.f32 %v2377_v61, %v2040_v8  ;;  %v1181_v63 = vpop.f32.mrb[47].mxu1  ;;  %2395 = vmatmul.mubr.msk.bf16.vlgmr.msra.gmra.mrb[56].mxu1 %vm254_vm1, %v1242_v55  ;;  %v1231_v1 = vmax.f32 %v1187_v58, 0.0 }
 0x55b   :  { %v1182_v0 = vadd.f32 %v2040_v8, %v1181_v63  ;;  %v1229_v3 = vmax.f32 %v1179_v60, 0.0  ;;  %2435 = vmatpush3.bf16.msra.mxu1 %v2530_v42  ;;  %v40_v42 = vld [vmem:[%s3005_s1 + $0x30] sm:$0xff] }
 0x55c   :  { %v1232_v2 = vmax.f32 %v1190_v62, 0.0  ;;  %2436 = vmatprep.subr.bf16.mxu1 %v2531_v45 }
 0x55d   :  { %v1230_v5 = vmax.f32 %v1182_v0, 0.0 }
 0x55e   :  { %v1244_v6 = vpack.c.bf16 %v1232_v2, %v1231_v1 }
 0x55f   :  { %v1243_v7 = vpack.c.bf16 %v1230_v5, %v1229_v3  ;;  %v2380_v10 = vpop.f32.mrb[48].mxu1  ;;  %2437 = vmatpush3.bf16.msra.mxu1 %v2531_v45 }
 0x560   :  { %v1203_v11 = vadd.f32 %v2380_v10, %v2040_v8  ;;  %v1194_v12 = vpop.f32.mrb[49].mxu1  ;;  %2438 = vmatprep.subr.bf16.mxu1 %v2532_v46 }
 0x561   :  { %v1195_v13 = vadd.f32 %v2040_v8, %v1194_v12  ;;  %v2381_v14 = vpop.f32.mrb[50].mxu1  ;;  %2398 = vmatprep.mubr.msk.bf16.mxu1 %vm254_vm1, %v1243_v7 }
 0x562   :  { %v1206_v17 = vadd.f32 %v2381_v14, %v2040_v8  ;;  %v1197_v18 = vpop.f32.mrb[51].mxu1  ;;  %2399 = vmatmul.mubr.msk.bf16.gmra.mrb[60].mxu1 %vm254_vm1, %v1244_v6  ;;  %v1235_v21 = vmax.f32 %v1203_v11, 0.0 }
 0x563   :  { %v1198_v19 = vadd.f32 %v2040_v8, %v1197_v18  ;;  %v1233_v23 = vmax.f32 %v1195_v13, 0.0  ;;  %2439 = vmatpush3.bf16.msra.mxu1 %v2532_v46  ;;  %v38_v46 = vld [vmem:[%s3005_s1 + $0x20] sm:$0xff] }
 0x564   :  { %v1236_v22 = vmax.f32 %v1206_v17, 0.0 }
 0x565   :  { %v1234_v24 = vmax.f32 %v1198_v19, 0.0 }
 0x566   :  { %v1246_v27 = vpack.c.bf16 %v1236_v22, %v1235_v21  ;;  %v2533_v22 = vld [vmem:[%s3002_s2 + $0x108] sm:$0xff]  }
 0x567   :  { %v1245_v28 = vpack.c.bf16 %v1234_v24, %v1233_v23  ;;  %v2384_v29 = vpop.f32.mrb[52].mxu1  ;;  %2440 = vmatprep.subr.bf16.mxu1 %v2533_v22  ;;  %v2534_v23 = vld [vmem:[%s3002_s2 + $0x110] sm:$0xff]   ;;  %v2535_v24 = vld [vmem:[%s3002_s2 + $0x118] sm:$0xff]  }
 0x568   :  { %v1219_v30 = vadd.f32 %v2384_v29, %v2040_v8  ;;  %v1210_v32 = vpop.f32.mrb[53].mxu1  ;;  %2441 = vmatpush3.bf16.msra.mxu1 %v2533_v22  ;;  %2458 = vmatprep.subr.bf16.mxu0 %v2534_v23  ;;  %v34_v29 = vld [vmem:[%s3005_s1] sm:$0xff]  ;;  %v47_v22 = vld [vmem:[%s3005_s1 + $0x68] sm:$0xff] }
 0x569   :  { %v1211_v31 = vadd.f32 %v2040_v8, %v1210_v32  ;;  %v2385_v33 = vpop.f32.mrb[54].mxu1  ;;  %2402 = vmatprep.mubr.msk.bf16.mxu1 %vm254_vm1, %v1245_v28  ;;  %v36_v28 = vld [vmem:[%s3005_s1 + $0x10] sm:$0xff]  ;;  %v37_v32 = vld [vmem:[%s3005_s1 + $0x18] sm:$0xff] }
 0x56a   :  { %v1222_v34 = vadd.f32 %v2385_v33, %v2040_v8  ;;  %v1213_v35 = vpop.f32.mrb[55].mxu1  ;;  %2403 = vmatmul.mubr.msk.bf16.gmra.mrb[64].mxu1 %vm254_vm1, %v1246_v27  ;;  %v1239_v38 = vmax.f32 %v1219_v30, 0.0  ;;  %v2536_v27 = vld [vmem:[%s3002_s2 + $0x120] sm:$0xff]  }
 0x56b   :  { %v1214_v36 = vadd.f32 %v2040_v8, %v1213_v35  ;;  %v1237_v37 = vmax.f32 %v1211_v31, 0.0 }
 0x56c   :  { %v1240_v39 = vmax.f32 %v1222_v34, 0.0  ;;  %v35_v34 = vld [vmem:[%s3005_s1 + $0x8] sm:$0xff] }
 0x56d   :  { %v1238_v40 = vmax.f32 %v1214_v36, 0.0 }
 0x56e   :  { %v1248_v41 = vpack.c.bf16 %v1240_v39, %v1239_v38 }
 0x56f   :  { %v1247_v43 = vpack.c.bf16 %v1238_v40, %v1237_v37 }
 0x571   :  { %2406 = vmatprep.mubr.msk.bf16.mxu1 %vm254_vm1, %v1247_v43 }
 0x572   :  { %2407 = vmatmul.mubr.msk.bf16.gmra.mrb[68].mxu1 %vm254_vm1, %v1248_v41 }
 0x62d   :  { %v2396_v47 = vpop.f32.mrb[56].mxu1 }
 0x62e   :  { %v1344_v4 = vpop.f32.mrb[57].mxu1  ;;  %v1353_v9 = vadd.f32 %v2396_v47, %v2053_v49 }
 0x62f   :  { %v2397_v8 = vpop.f32.mrb[58].mxu1  ;;  %v1345_v20 = vadd.f32 %v2053_v49, %v1344_v4  ;;  %v41_v4 = vld [vmem:[%s3005_s1 + $0x38] sm:$0xff] }
 0x630   :  { %v1356_v15 = vadd.f32 %v2397_v8, %v2053_v49  ;;  %v1347_v16 = vpop.f32.mrb[59].mxu1 }
 0x631   :  { %v1348_v25 = vadd.f32 %v2053_v49, %v1347_v16 }
 0x632   :  { %v1408_v26 = vpack.c.bf16 %v1356_v15, %v1353_v9  ;;  %v39_v15 = vld [vmem:[%s3005_s1 + $0x28] sm:$0xff] }
 0x633   :  { %v1407_v48 = vpack.c.bf16 %v1348_v25, %v1345_v20 }
 0x635   :  { %v2400_v50 = vpop.f32.mrb[60].mxu1  ;;  %2418 = vmatprep.mubr.msk.bf16.mxu0 %vm254_vm1, %v1407_v48 }
 0x636   :  { %v1360_v51 = vpop.f32.mrb[61].mxu1  ;;  %2419 = vmatmul.mubr.msk.bf16.vlgmr.msra.gmra.mrb[40].mxu0 %vm254_vm1, %v1408_v26  ;;  %v1369_v53 = vadd.f32 %v2400_v50, %v2053_v49 }
 0x637   :  { %v2401_v52 = vpop.f32.mrb[62].mxu1  ;;  %v1361_v56 = vadd.f32 %v2053_v49, %v1360_v51  ;;  %2459 = vmatpush3.bf16.msra.mxu0 %v2534_v23 }
 0x638   :  { %v1372_v54 = vadd.f32 %v2401_v52, %v2053_v49  ;;  %v1363_v55 = vpop.f32.mrb[63].mxu1  ;;  %2460 = vmatprep.subr.bf16.mxu0 %v2535_v24 }
 0x639   :  { %v1364_v57 = vadd.f32 %v2053_v49, %v1363_v55 }
 0x63a   :  { %v1410_v58 = vpack.c.bf16 %v1372_v54, %v1369_v53  ;;  %v44_v54 = vld [vmem:[%s3005_s1 + $0x50] sm:$0xff] }
 0x63b   :  { %v1409_v59 = vpack.c.bf16 %v1364_v57, %v1361_v56  ;;  %2461 = vmatpush3.bf16.msra.mxu0 %v2535_v24  ;;  %v42_v56 = vld [vmem:[%s3005_s1 + $0x40] sm:$0xff] }
 0x63c   :  { %2462 = vmatprep.subr.bf16.mxu0 %v2536_v27 }
 0x63d   :  { %v2404_v60 = vpop.f32.mrb[64].mxu1  ;;  %2422 = vmatprep.mubr.msk.bf16.mxu0 %vm254_vm1, %v1409_v59  ;;  %v45_v59 = vld [vmem:[%s3005_s1 + $0x58] sm:$0xff] }
 0x63e   :  { %v1376_v61 = vpop.f32.mrb[65].mxu1  ;;  %2423 = vmatmul.mubr.msk.bf16.gmra.mrb[44].mxu0 %vm254_vm1, %v1410_v58  ;;  %v1385_v63 = vadd.f32 %v2404_v60, %v2053_v49 }
 0x63f   :  { %v2405_v62 = vpop.f32.mrb[66].mxu1  ;;  %v1377_v2 = vadd.f32 %v2053_v49, %v1376_v61  ;;  %2463 = vmatpush3.bf16.msra.mxu0 %v2536_v27 }
 0x640   :  { %v1388_v0 = vadd.f32 %v2405_v62, %v2053_v49  ;;  %v1379_v1 = vpop.f32.mrb[67].mxu1  ;;  %v43_v62 = vld [vmem:[%s3005_s1 + $0x48] sm:$0xff] }
 0x641   :  { %v1380_v3 = vadd.f32 %v2053_v49, %v1379_v1 }
 0x642   :  { %v1412_v5 = vpack.c.bf16 %v1388_v0, %v1385_v63 }
 0x643   :  { %v1411_v6 = vpack.c.bf16 %v1380_v3, %v1377_v2 }
 0x645   :  { %v2408_v7 = vpop.f32.mrb[68].mxu1  ;;  %2426 = vmatprep.mubr.msk.bf16.mxu0 %vm254_vm1, %v1411_v6 }
 0x646   :  { %v1392_v10 = vpop.f32.mrb[69].mxu1  ;;  %2427 = vmatmul.mubr.msk.bf16.gmra.mrb[48].mxu0 %vm254_vm1, %v1412_v5  ;;  %v1401_v12 = vadd.f32 %v2408_v7, %v2053_v49 }
 0x647   :  { %v2409_v11 = vpop.f32.mrb[70].mxu1  ;;  %v1393_v17 = vadd.f32 %v2053_v49, %v1392_v10 }
 0x648   :  { %v1404_v13 = vadd.f32 %v2409_v11, %v2053_v49  ;;  %v1395_v14 = vpop.f32.mrb[71].mxu1  ;;  %v48_v11 = vld [vmem:[%s3005_s1 + $0x70] sm:$0xff] }
 0x649   :  { %v1396_v18 = vadd.f32 %v2053_v49, %v1395_v14 }
 0x64a   :  { %v1414_v19 = vpack.c.bf16 %v1404_v13, %v1401_v12  ;;  %v46_v13 = vld [vmem:[%s3005_s1 + $0x60] sm:$0xff] }
 0x64b   :  { %v1413_v21 = vpack.c.bf16 %v1396_v18, %v1393_v17  ;;  %v49_v18 = vld [vmem:[%s3005_s1 + $0x78] sm:$0xff] }
 0x64d   :  { %2430 = vmatprep.mubr.msk.bf16.mxu0 %vm254_vm1, %v1413_v21 }
 0x64e   :  { %2431 = vmatmul.mubr.msk.bf16.gmra.mrb[52].mxu0 %vm254_vm1, %v1414_v19 }
 0x709   :  { %v2420_v30 = vpop.f32.mrb[40].mxu0 }
 0x70a   :  { %v1514_v31 = vadd.f32 %v2420_v30, %v36_v28  ;;  %v1505_v33 = vpop.f32.mrb[41].mxu0 }
 0x70b   :  { %v1506_v35 = vadd.f32 %v1505_v33, %v34_v29  ;;  %v2421_v36 = vpop.f32.mrb[42].mxu0 }
 0x70c   :  { %v1517_v38 = vadd.f32 %v2421_v36, %v37_v32  ;;  %v1508_v39 = vpop.f32.mrb[43].mxu0  ;;  %v1570_v40 = vmax.f32 %v1514_v31, 0.0  ;;  %v2537_v36 = vld [vmem:[%s3002_s2 + $0x128] sm:$0xff]  }
 0x70d   :  { %v1509_v37 = vadd.f32 %v1508_v39, %v35_v34  ;;  %v1568_v43 = vmax.f32 %v1506_v35, 0.0  ;;  %2464 = vmatprep.subr.bf16.mxu0 %v2537_v36 }
 0x70e   :  { %v1571_v41 = vmax.f32 %v1517_v38, 0.0  ;;  %2465 = vmatpush3.bf16.msra.mxu0 %v2537_v36  ;;  %v2078_v38 = vld [vmem:[%s3004_s3 + $0x7] ss:$0 sm:$0xff] }
 0x70f   :  { %v1569_v44 = vmax.f32 %v1509_v37, 0.0 }
 0x710   :  { %v1585_v45 = vpack.c.bf16 %v1571_v41, %v1570_v40 }
 0x711   :  { %v1584_v47 = vpack.c.bf16 %v1569_v44, %v1568_v43  ;;  %v2424_v49 = vpop.f32.mrb[44].mxu0 }
 0x712   :  { %v1530_v8 = vadd.f32 %v2424_v49, %v40_v42  ;;  %v1521_v9 = vpop.f32.mrb[45].mxu0 }
 0x713   :  { %v1522_v16 = vadd.f32 %v1521_v9, %v38_v46  ;;  %v2425_v20 = vpop.f32.mrb[46].mxu0  ;;  %2442 = vmatprep.mubr.msk.bf16.mxu1 %vm254_vm1, %v1584_v47 }
 0x714   :  { %v1533_v25 = vadd.f32 %v2425_v20, %v41_v4  ;;  %v1524_v26 = vpop.f32.mrb[47].mxu0  ;;  %2443 = vmatmul.mubr.msk.bf16.vlgmr.msra.gmra.mrb[72].mxu1 %vm254_vm1, %v1585_v45  ;;  %v1574_v50 = vmax.f32 %v1530_v8, 0.0 }
 0x715   :  { %v1525_v48 = vadd.f32 %v1524_v26, %v39_v15  ;;  %v1572_v52 = vmax.f32 %v1522_v16, 0.0 }
 0x716   :  { %v1575_v51 = vmax.f32 %v1533_v25, 0.0 }
 0x717   :  { %v1573_v53 = vmax.f32 %v1525_v48, 0.0 }
 0x718   :  { %v1587_v55 = vpack.c.bf16 %v1575_v51, %v1574_v50 }
 0x719   :  { %v1586_v57 = vpack.c.bf16 %v1573_v53, %v1572_v52  ;;  %v2428_v58 = vpop.f32.mrb[48].mxu0 }
 0x71a   :  { %v1546_v60 = vadd.f32 %v2428_v58, %v44_v54  ;;  %v1537_v61 = vpop.f32.mrb[49].mxu0 }
 0x71b   :  { %v1538_v63 = vadd.f32 %v1537_v61, %v42_v56  ;;  %v2429_v0 = vpop.f32.mrb[50].mxu0  ;;  %2446 = vmatprep.mubr.msk.bf16.mxu1 %vm254_vm1, %v1586_v57 }
 0x71c   :  { %v1549_v1 = vadd.f32 %v2429_v0, %v45_v59  ;;  %v1540_v2 = vpop.f32.mrb[51].mxu0  ;;  %2447 = vmatmul.mubr.msk.bf16.gmra.mrb[76].mxu1 %vm254_vm1, %v1587_v55  ;;  %v1578_v5 = vmax.f32 %v1546_v60, 0.0 }
 0x71d   :  { %v1541_v3 = vadd.f32 %v1540_v2, %v43_v62  ;;  %v1576_v7 = vmax.f32 %v1538_v63, 0.0 }
 0x71e   :  { %v1579_v6 = vmax.f32 %v1549_v1, 0.0 }
 0x71f   :  { %v1577_v10 = vmax.f32 %v1541_v3, 0.0 }
 0x720   :  { %v1589_v12 = vpack.c.bf16 %v1579_v6, %v1578_v5 }
 0x721   :  { %v1588_v14 = vpack.c.bf16 %v1577_v10, %v1576_v7  ;;  %v2432_v17 = vpop.f32.mrb[52].mxu0 }
 0x722   :  { %v1562_v19 = vadd.f32 %v2432_v17, %v48_v11  ;;  %v1553_v21 = vpop.f32.mrb[53].mxu0 }
 0x723   :  { %v1554_v23 = vadd.f32 %v1553_v21, %v46_v13  ;;  %v2433_v24 = vpop.f32.mrb[54].mxu0  ;;  %2450 = vmatprep.mubr.msk.bf16.mxu1 %vm254_vm1, %v1588_v14 }
 0x724   :  { %v1565_v27 = vadd.f32 %v2433_v24, %v49_v18  ;;  %v1556_v28 = vpop.f32.mrb[55].mxu0  ;;  %2451 = vmatmul.mubr.msk.bf16.gmra.mrb[80].mxu1 %vm254_vm1, %v1589_v12  ;;  %v1582_v30 = vmax.f32 %v1562_v19, 0.0 }
 0x725   :  { %v1557_v29 = vadd.f32 %v1556_v28, %v47_v22  ;;  %v1580_v31 = vmax.f32 %v1554_v23, 0.0 }
 0x726   :  { %v1583_v32 = vmax.f32 %v1565_v27, 0.0 }
 0x727   :  { %v1581_v33 = vmax.f32 %v1557_v29, 0.0 }
 0x728   :  { %v1591_v34 = vpack.c.bf16 %v1583_v32, %v1582_v30  ;;  %v2091_v30 = vld [vmem:[%s3004_s3 + $0x8] ss:$0 sm:$0xff] }
 0x729   :  { %v1590_v35 = vpack.c.bf16 %v1581_v33, %v1580_v31 }
 0x72b   :  { %2454 = vmatprep.mubr.msk.bf16.mxu1 %vm254_vm1, %v1590_v35 }
 0x72c   :  { %2455 = vmatmul.mubr.msk.bf16.gmra.mrb[84].mxu1 %vm254_vm1, %v1591_v34 }
 0x7e7   :  { %v2444_v39 = vpop.f32.mrb[72].mxu1 }
 0x7e8   :  { %v1696_v37 = vadd.f32 %v2444_v39, %v2078_v38  ;;  %v1687_v40 = vpop.f32.mrb[73].mxu1 }
 0x7e9   :  { %v1688_v41 = vadd.f32 %v2078_v38, %v1687_v40  ;;  %v2445_v43 = vpop.f32.mrb[74].mxu1 }
 0x7ea   :  { %v1699_v44 = vadd.f32 %v2445_v43, %v2078_v38  ;;  %v1690_v42 = vpop.f32.mrb[75].mxu1  ;;  %v1752_v46 = vmax.f32 %v1696_v37, 0.0 }
 0x7eb   :  { %v1691_v45 = vadd.f32 %v2078_v38, %v1690_v42  ;;  %v1750_v49 = vmax.f32 %v1688_v41, 0.0 }
 0x7ec   :  { %v1753_v47 = vmax.f32 %v1699_v44, 0.0 }
 0x7ed   :  { %v1751_v4 = vmax.f32 %v1691_v45, 0.0 }
 0x7ee   :  { %v1767_v8 = vpack.c.bf16 %v1753_v47, %v1752_v46 }
 0x7ef   :  { %v1766_v9 = vpack.c.bf16 %v1751_v4, %v1750_v49  ;;  %v2448_v15 = vpop.f32.mrb[76].mxu1 }
 0x7f0   :  { %v1712_v16 = vadd.f32 %v2448_v15, %v2078_v38  ;;  %v1703_v20 = vpop.f32.mrb[77].mxu1 }
 0x7f1   :  { %v1704_v25 = vadd.f32 %v2078_v38, %v1703_v20  ;;  %v2449_v26 = vpop.f32.mrb[78].mxu1  ;;  %2466 = vmatprep.mubr.msk.bf16.mxu0 %vm254_vm1, %v1766_v9 }
 0x7f2   :  { %v1715_v48 = vadd.f32 %v2449_v26, %v2078_v38  ;;  %v1706_v50 = vpop.f32.mrb[79].mxu1  ;;  %2467 = vmatmul.mubr.msk.bf16.vlgmr.msra.gmra.mrb[56].mxu0 %vm254_vm1, %v1767_v8  ;;  %v1756_v52 = vmax.f32 %v1712_v16, 0.0 }
 0x7f3   :  { %v1707_v51 = vadd.f32 %v2078_v38, %v1706_v50  ;;  %v1754_v54 = vmax.f32 %v1704_v25, 0.0 }
 0x7f4   :  { %v1757_v53 = vmax.f32 %v1715_v48, 0.0 }
 0x7f5   :  { %v1755_v55 = vmax.f32 %v1707_v51, 0.0 }
 0x7f6   :  { %v1769_v56 = vpack.c.bf16 %v1757_v53, %v1756_v52 }
 0x7f7   :  { %v1768_v57 = vpack.c.bf16 %v1755_v55, %v1754_v54  ;;  %v2452_v58 = vpop.f32.mrb[80].mxu1 }
 0x7f8   :  { %v1728_v59 = vadd.f32 %v2452_v58, %v2078_v38  ;;  %v1719_v60 = vpop.f32.mrb[81].mxu1 }
 0x7f9   :  { %v1720_v61 = vadd.f32 %v2078_v38, %v1719_v60  ;;  %v2453_v62 = vpop.f32.mrb[82].mxu1  ;;  %2470 = vmatprep.mubr.msk.bf16.mxu0 %vm254_vm1, %v1768_v57 }
 0x7fa   :  { %v1731_v63 = vadd.f32 %v2453_v62, %v2078_v38  ;;  %v1722_v0 = vpop.f32.mrb[83].mxu1  ;;  %2471 = vmatmul.mubr.msk.bf16.gmra.mrb[60].mxu0 %vm254_vm1, %v1769_v56  ;;  %v1760_v2 = vmax.f32 %v1728_v59, 0.0 }
 0x7fb   :  { %v1723_v1 = vadd.f32 %v2078_v38, %v1722_v0  ;;  %v1758_v5 = vmax.f32 %v1720_v61, 0.0 }
 0x7fc   :  { %v1761_v3 = vmax.f32 %v1731_v63, 0.0 }
 0x7fd   :  { %v1759_v6 = vmax.f32 %v1723_v1, 0.0 }
 0x7fe   :  { %v1771_v7 = vpack.c.bf16 %v1761_v3, %v1760_v2 }
 0x7ff   :  { %v1770_v10 = vpack.c.bf16 %v1759_v6, %v1758_v5  ;;  %v2456_v11 = vpop.f32.mrb[84].mxu1 }
 0x800   :  { %v1744_v12 = vadd.f32 %v2456_v11, %v2078_v38  ;;  %v1735_v13 = vpop.f32.mrb[85].mxu1 }
 0x801   :  { %v1736_v14 = vadd.f32 %v2078_v38, %v1735_v13  ;;  %v2457_v17 = vpop.f32.mrb[86].mxu1  ;;  %2474 = vmatprep.mubr.msk.bf16.mxu0 %vm254_vm1, %v1770_v10 }
 0x802   :  { %v1747_v18 = vadd.f32 %v2457_v17, %v2078_v38  ;;  %v1738_v19 = vpop.f32.mrb[87].mxu1  ;;  %2475 = vmatmul.mubr.msk.bf16.gmra.mrb[64].mxu0 %vm254_vm1, %v1771_v7  ;;  %v1764_v22 = vmax.f32 %v1744_v12, 0.0 }
 0x803   :  { %v1739_v21 = vadd.f32 %v2078_v38, %v1738_v19  ;;  %v1762_v24 = vmax.f32 %v1736_v14, 0.0 }
 0x804   :  { %v1765_v23 = vmax.f32 %v1747_v18, 0.0 }
 0x805   :  { %v1763_v27 = vmax.f32 %v1739_v21, 0.0 }
 0x806   :  { %v1773_v28 = vpack.c.bf16 %v1765_v23, %v1764_v22 }
 0x807   :  { %v1772_v29 = vpack.c.bf16 %v1763_v27, %v1762_v24 }
 0x809   :  { %2478 = vmatprep.mubr.msk.bf16.mxu0 %vm254_vm1, %v1772_v29 }
 0x80a   :  { %2479 = vmatmul.mubr.msk.bf16.gmra.mrb[68].mxu0 %vm254_vm1, %v1773_v28 }
 0x8c5   :  { %v2468_v32 = vpop.f32.mrb[56].mxu0 }
 0x8c6   :  { %v1878_v31 = vadd.f32 %v2468_v32, %v2091_v30  ;;  %v1869_v33 = vpop.f32.mrb[57].mxu0 }
 0x8c7   :  { %v1870_v34 = vadd.f32 %v2091_v30, %v1869_v33  ;;  %v2469_v35 = vpop.f32.mrb[58].mxu0 }
 0x8c8   :  { %v1934_v36 = vmax.f32 %v1878_v31, 0.0  ;;  %v1881_v38 = vadd.f32 %v2469_v35, %v2091_v30  ;;  %v1872_v39 = vpop.f32.mrb[59].mxu0 }
 0x8c9   :  { %v1932_v37 = vmax.f32 %v1870_v34, 0.0  ;;  %v1873_v40 = vadd.f32 %v2091_v30, %v1872_v39 }
 0x8ca   :  { %1951 = vst.msk [vmem:[%s3006_s4 + $0x10] sm:$0xff] %vm1948_vm2, %v1934_v36  ;;  %v1935_v41 = vmax.f32 %v1881_v38, 0.0 }
 0x8cb   :  { %1949 = vst.msk [vmem:[%s3006_s4] sm:$0xff] %vm1948_vm2, %v1932_v37  ;;  %v1933_v43 = vmax.f32 %v1873_v40, 0.0 }
 0x8cc   :  { %1952 = vst.msk [vmem:[%s3006_s4 + $0x18] sm:$0xff] %vm1948_vm2, %v1935_v41 }
 0x8cd   :  { %1950 = vst.msk [vmem:[%s3006_s4 + $0x8] sm:$0xff] %vm1948_vm2, %v1933_v43  ;;  %v2472_v44 = vpop.f32.mrb[60].mxu0 }
 0x8ce   :  { %v1894_v42 = vadd.f32 %v2472_v44, %v2091_v30  ;;  %v1885_v45 = vpop.f32.mrb[61].mxu0 }
 0x8cf   :  { %v1886_v46 = vadd.f32 %v2091_v30, %v1885_v45  ;;  %v2473_v47 = vpop.f32.mrb[62].mxu0 }
 0x8d0   :  { %v1938_v49 = vmax.f32 %v1894_v42, 0.0  ;;  %v1897_v4 = vadd.f32 %v2473_v47, %v2091_v30  ;;  %v1888_v8 = vpop.f32.mrb[63].mxu0 }
 0x8d1   :  { %v1936_v9 = vmax.f32 %v1886_v46, 0.0  ;;  %v1889_v15 = vadd.f32 %v2091_v30, %v1888_v8 }
 0x8d2   :  { %1955 = vst.msk [vmem:[%s3006_s4 + $0x30] sm:$0xff] %vm1948_vm2, %v1938_v49  ;;  %v1939_v16 = vmax.f32 %v1897_v4, 0.0 }
 0x8d3   :  { %1953 = vst.msk [vmem:[%s3006_s4 + $0x20] sm:$0xff] %vm1948_vm2, %v1936_v9  ;;  %v1937_v20 = vmax.f32 %v1889_v15, 0.0 }
 0x8d4   :  { %1956 = vst.msk [vmem:[%s3006_s4 + $0x38] sm:$0xff] %vm1948_vm2, %v1939_v16 }
 0x8d5   :  { %1954 = vst.msk [vmem:[%s3006_s4 + $0x28] sm:$0xff] %vm1948_vm2, %v1937_v20  ;;  %v2476_v25 = vpop.f32.mrb[64].mxu0 }
 0x8d6   :  { %v1910_v26 = vadd.f32 %v2476_v25, %v2091_v30  ;;  %v1901_v48 = vpop.f32.mrb[65].mxu0 }
 0x8d7   :  { %v1902_v50 = vadd.f32 %v2091_v30, %v1901_v48  ;;  %v2477_v51 = vpop.f32.mrb[66].mxu0 }
 0x8d8   :  { %v1942_v52 = vmax.f32 %v1910_v26, 0.0  ;;  %v1913_v53 = vadd.f32 %v2477_v51, %v2091_v30  ;;  %v1904_v54 = vpop.f32.mrb[67].mxu0 }
 0x8d9   :  { %v1940_v55 = vmax.f32 %v1902_v50, 0.0  ;;  %v1905_v56 = vadd.f32 %v2091_v30, %v1904_v54 }
 0x8da   :  { %1959 = vst.msk [vmem:[%s3006_s4 + $0x50] sm:$0xff] %vm1948_vm2, %v1942_v52  ;;  %v1943_v57 = vmax.f32 %v1913_v53, 0.0 }
 0x8db   :  { %1957 = vst.msk [vmem:[%s3006_s4 + $0x40] sm:$0xff] %vm1948_vm2, %v1940_v55  ;;  %v1941_v58 = vmax.f32 %v1905_v56, 0.0 }
 0x8dc   :  { %1960 = vst.msk [vmem:[%s3006_s4 + $0x58] sm:$0xff] %vm1948_vm2, %v1943_v57 }
 0x8dd   :  { %1958 = vst.msk [vmem:[%s3006_s4 + $0x48] sm:$0xff] %vm1948_vm2, %v1941_v58  ;;  %v2480_v59 = vpop.f32.mrb[68].mxu0 }
 0x8de   :  { %v1926_v60 = vadd.f32 %v2480_v59, %v2091_v30  ;;  %v1917_v61 = vpop.f32.mrb[69].mxu0 }
 0x8df   :  { %v1918_v62 = vadd.f32 %v2091_v30, %v1917_v61  ;;  %v2481_v63 = vpop.f32.mrb[70].mxu0 }
 0x8e0   :  { %v1946_v0 = vmax.f32 %v1926_v60, 0.0  ;;  %v1929_v1 = vadd.f32 %v2481_v63, %v2091_v30  ;;  %v1920_v2 = vpop.f32.mrb[71].mxu0 }
 0x8e1   :  { %v1944_v3 = vmax.f32 %v1918_v62, 0.0  ;;  %v1921_v5 = vadd.f32 %v2091_v30, %v1920_v2 }
 0x8e2   :  { %1963 = vst.msk [vmem:[%s3006_s4 + $0x70] sm:$0xff] %vm1948_vm2, %v1946_v0  ;;  %v1947_v6 = vmax.f32 %v1929_v1, 0.0 }
 0x8e3   :  { %1961 = vst.msk [vmem:[%s3006_s4 + $0x60] sm:$0xff] %vm1948_vm2, %v1944_v3  ;;  %v1945_v7 = vmax.f32 %v1921_v5, 0.0 }
 0x8e4   :  { %1964 = vst.msk [vmem:[%s3006_s4 + $0x78] sm:$0xff] %vm1948_vm2, %v1947_v6 }
 0x8e5   :  { %1962 = vst.msk [vmem:[%s3006_s4 + $0x68] sm:$0xff] %vm1948_vm2, %v1945_v7 }

</bundles_post_ra>
